<compile_context>
chip_gen: v7x
topology: tpu7x:2x2x1
jax: 0.10.0
libtpu: 0.0.40
codegen_flags: <defaults>
</compile_context>

<pallas_src>
import functools

import jax
import jax.numpy as jnp
from jax.experimental import pallas as pl
from jax.experimental.pallas import tpu as pltpu

BN_EPS = 1e-5


# ------------------------------ Pallas kernels -------------------------------


def relconv_bn_kernel(adj_ref, invdeg_ref, xwl_ref, xt_ref, wrc_ref, bl_ref,
                      scale_ref, shift_ref, hbn_ref, *, h_dim):
    """Phase 1: 5 relation SAGEConvs + ReLU + inference-BN for one row tile.

    adj_ref    (5, TN, Np) int8  per-relation incoming-edge counts (row tile)
    invdeg_ref (5, TN, 1)  f32   per-relation 1/deg_in for the tile rows
    xwl_ref    (Np, F5P)   bf16  lin_l folded into the RHS: lanes r*H..(r+1)*H-1
                                 hold x @ wl_r (padding lanes are zero)
    xt_ref     (TN, C)     f32   node-feature row tile (lin_r path)
    wrc_ref    (C, F5P)    f32   concatenated lin_r weights (zero-padded lanes)
    bl_ref     (1, F5P)    f32   concatenated lin_l biases
    scale_ref  (1, F5P)    f32   BN scale = gamma * rsqrt(var + eps) (pad = 0)
    shift_ref  (1, F5P)    f32   BN shift = beta - mean * scale       (pad = 0)
    hbn_ref    (TN, F5P)   bf16  output tile (128-lane dense store)
    """
    tn, f5p = hbn_ref.shape

    # lin_r path: one lane-dense (C, F5P) matmul.
    h = jnp.dot(xt_ref[...], wrc_ref[...], preferred_element_type=jnp.float32)

    lane = jax.lax.broadcasted_iota(jnp.int32, (tn, f5p), 1)
    for r in range(5):  # static unroll over relations
        # int8 counts -> bf16 (exact for small integer counts).  Two-step cast
        # keeps the Mosaic lowering on well-trodden paths.
        cnt = adj_ref[r].astype(jnp.float32).astype(jnp.bfloat16)      # (TN, Np)
        # ONE full-lane-width MXU pass per relation over the O(N^2) term; the
        # relation's H-lane block is then selected with a static lane mask.
        # (Same vmatmul count as a C-lane-wide output while F5P <= MXU width.)
        aggl = jnp.dot(cnt, xwl_ref[...],
                       preferred_element_type=jnp.float32)             # (TN, F5P)
        aggl = aggl * invdeg_ref[r]                                    # mean norm
        in_block = (lane >= r * h_dim) & (lane < (r + 1) * h_dim)
        h = h + jnp.where(in_block, aggl, 0.0)

    # bias + ReLU, then inference BatchNorm folded to a single FMA.
    h = jnp.maximum(h + bl_ref[...], 0.0)
    hbn_ref[...] = (h * scale_ref[...] + shift_ref[...]).astype(hbn_ref.dtype)


def mu_logvar_kernel(adjf_ref, invdegf_ref, hbnf_ref, wl2_ref, wr2_ref, b2_ref,
                     out_ref):
    """Phase 2: fused conv_mu | conv_logvar over the full edge set.

    adjf_ref    (TN, Np)   int8  full-graph incoming-edge counts (row tile)
    invdegf_ref (TN, 1)    f32   1/deg_in for the tile rows
    hbnf_ref    (Np, F5P)  bf16  full BN output (aggregation RHS + lin_r rows)
    wl2_ref     (F5P, OP)  f32   [wmu_l | wlogvar_l] (zero-padded)
    wr2_ref     (F5P, OP)  f32   [wmu_r | wlogvar_r] (zero-padded)
    b2_ref      (1, OP)    f32   [b_mu  | b_logvar ] (zero-padded)
    out_ref     (TN, OP)   f32   [mu | logvar] row tile (128-lane dense store)
    """
    tn = out_ref.shape[0]

    cnt = adjf_ref[...].astype(jnp.float32).astype(jnp.bfloat16)       # (TN, Np)
    aggr = jnp.dot(cnt, hbnf_ref[...],
                   preferred_element_type=jnp.float32)                 # (TN, F5P)
    aggr = aggr * invdegf_ref[...]

    # lin_r rows come straight from the resident hbn buffer (no extra DMA'd
    # row-tile input); mixed bf16 x f32 dot handles the upcast.
    row0 = pl.multiple_of(pl.program_id(0) * tn, tn)
    hbn_tile = hbnf_ref[pl.ds(row0, tn), :]                            # (TN, F5P)

    out = (jnp.dot(aggr, wl2_ref[...], preferred_element_type=jnp.float32)
           + jnp.dot(hbn_tile, wr2_ref[...], preferred_element_type=jnp.float32)
           + b2_ref[...])
    out_ref[...] = out


# --------------------------------- wrapper -----------------------------------


def _round_up(a, b):
    return (a + b - 1) // b * b


def _resident(shape):
    nd = len(shape)
    return pl.BlockSpec(shape, lambda i, _nd=nd: (0,) * _nd)


def encoder_vgae_forward(x, counts5, invdeg5, counts_full, invdeg_full, params,
                         *, row_block=None):
    """Forward pass of Encoder_VGAE (eval mode).  Returns (mu, logvar).

    x           (N, C)    f32   node features
    counts5     (5, N, N) int8  per-relation incoming-edge counts
    invdeg5     (5, N, 1) f32   per-relation 1 / max(deg_in, 1)
    counts_full (N, N)    int8  full-graph incoming-edge counts
    invdeg_full (N, 1)    f32   1 / max(deg_in, 1) over all edges
    """
    N, C = x.shape
    H = params["wl"].shape[-1]
    F5 = 5 * H
    O = params["bmu"].shape[-1]
    F5P = _round_up(F5, 128)          # lane-dense hidden width
    OP = _round_up(2 * O, 128)        # lane-dense mu|logvar head width

    # ------------------- generation-aware VMEM budget / tile ------------------
    try:
        vmem_cap = int(pltpu.get_tpu_info().vmem_capacity_bytes)
    except Exception:
        vmem_cap = 64 * 1024 * 1024   # conservative (v7x-sized) fallback
    vmem_limit = min(vmem_cap * 3 // 4, 100 * 1024 * 1024)

    tn = int(row_block) if row_block is not None else 256
    tn = min(max(tn, 32), _round_up(N, 32))
    tn = _round_up(tn, 32)            # int8 sublane tiling is (32, 128)
    while True:
        n_pad = _round_up(N, tn)
        need = (2 * 5 * tn * n_pad            # double-buffered (5,TN,Np) int8 tile
                + 6 * tn * n_pad              # in-kernel i8->f32->bf16 temporaries
                + 2 * n_pad * F5P             # resident xwl / hbn (bf16)
                + 12 * tn * F5P               # output tiles + f32 accumulators
                + 4 * (C * F5P + 4 * F5P + tn * C))
        if need <= int(0.7 * vmem_limit) or tn <= 32:
            break
        tn = max(32, (tn // 2) // 32 * 32)
    TN = tn
    Np = _round_up(N, TN)
    G = Np // TN

    # ------------------------- zero-pad node dimension ------------------------
    # (For large graphs, build the count matrices at the padded size directly
    # instead of paying this one-time XLA pad of the dominant tensor.)
    if Np != N:
        p = Np - N
        counts5 = jnp.pad(counts5, ((0, 0), (0, p), (0, p)))
        invdeg5 = jnp.pad(invdeg5, ((0, 0), (0, p), (0, 0)))
        counts_full = jnp.pad(counts_full, ((0, p), (0, p)))
        invdeg_full = jnp.pad(invdeg_full, ((0, p), (0, 0)))
        x_pad = jnp.pad(x, ((0, p), (0, 0)))
    else:
        x_pad = x

    # --------------------- parameter prep (small, one-time) -------------------
    wl, wr, bl = params["wl"], params["wr"], params["bl"]
    # concatenated lin_r weights -> one lane-dense (C, F5P) matmul
    wr_cat = jnp.pad(jnp.transpose(wr, (1, 0, 2)).reshape(C, F5),
                     ((0, 0), (0, F5P - F5)))
    bl_cat = jnp.pad(jnp.transpose(bl, (1, 0, 2)).reshape(1, F5),
                     ((0, 0), (0, F5P - F5)))
    # inference BatchNorm folded to a single scale/shift FMA (exact); padded
    # lanes get scale=0 / shift=0 so hbn padding is exactly zero.
    scale = params["gamma"] * jax.lax.rsqrt(params["rvar"] + BN_EPS)
    shift = params["beta"] - params["rmean"] * scale
    scale = jnp.pad(scale, ((0, 0), (0, F5P - F5)))
    shift = jnp.pad(shift, ((0, 0), (0, F5P - F5)))
    # lin_l folded into the aggregation RHS: xwl[:, r*H:(r+1)*H] = x @ wl_r.
    # O(N*C*H) work, negligible next to the O(N^2) aggregation.
    xwl = jnp.einsum("nc,rch->nrh", x_pad, wl).reshape(Np, F5)
    xwl = jnp.pad(xwl, ((0, 0), (0, F5P - F5))).astype(jnp.bfloat16)
    # fused + lane-padded mu|logvar head
    wl2 = jnp.pad(jnp.concatenate([params["wmul"], params["wlvl"]], axis=1),
                  ((0, F5P - F5), (0, OP - 2 * O)))
    wr2 = jnp.pad(jnp.concatenate([params["wmur"], params["wlvr"]], axis=1),
                  ((0, F5P - F5), (0, OP - 2 * O)))
    b2 = jnp.pad(jnp.concatenate([params["bmu"], params["blv"]], axis=1),
                 ((0, 0), (0, OP - 2 * O)))

    cparams = pltpu.CompilerParams(
        dimension_semantics=("parallel",),
        vmem_limit_bytes=int(vmem_limit),
    )

    # ---- phase 1: relation SAGEConvs + ReLU + BN -> hbn (Np, F5P) bf16 -------
    hbn = pl.pallas_call(
        functools.partial(relconv_bn_kernel, h_dim=H),
        grid=(G,),
        in_specs=[
            pl.BlockSpec((5, TN, Np), lambda i: (0, i, 0)),   # int8 counts tile
            pl.BlockSpec((5, TN, 1), lambda i: (0, i, 0)),    # 1/deg tile
            _resident((Np, F5P)),                             # xwl (bf16)
            pl.BlockSpec((TN, C), lambda i: (i, 0)),          # x row tile (f32)
            _resident((C, F5P)),                              # wr_cat
            _resident((1, F5P)),                              # bl_cat
            _resident((1, F5P)),                              # bn scale
            _resident((1, F5P)),                              # bn shift
        ],
        out_specs=pl.BlockSpec((TN, F5P), lambda i: (i, 0)),
        out_shape=jax.ShapeDtypeStruct((Np, F5P), jnp.bfloat16),
        compiler_params=cparams,
    )(counts5, invdeg5, xwl, x_pad, wr_cat, bl_cat, scale, shift)

    # ---- phase 2: fused conv_mu | conv_logvar over the full edge set ---------
    out = pl.pallas_call(
        mu_logvar_kernel,
        grid=(G,),
        in_specs=[
            pl.BlockSpec((TN, Np), lambda i: (i, 0)),         # int8 counts tile
            pl.BlockSpec((TN, 1), lambda i: (i, 0)),          # 1/deg tile
            _resident((Np, F5P)),                             # hbn (bf16)
            _resident((F5P, OP)),                             # [wmul | wlvl]
            _resident((F5P, OP)),                             # [wmur | wlvr]
            _resident((1, OP)),                               # [bmu  | blv ]
        ],
        out_specs=pl.BlockSpec((TN, OP), lambda i: (i, 0)),
        out_shape=jax.ShapeDtypeStruct((Np, OP), jnp.float32),
        compiler_params=cparams,
    )(counts_full, invdeg_full, hbn, wl2, wr2, b2)

    return out[:N, :O], out[:N, O:2 * O]


# --------- plain-JAX glue: sparse edges -> dense counts + 1/deg --------------


def build_count_adj(edge_index, edge_mask, num_nodes):
    """Incoming-edge counts and per-row 1/deg for PyG SAGEConv mean aggregation.

    counts[i, j] = #edges j->i in the masked edge set (int8; assumes < 128
    duplicate edges per (i, j) pair), invdeg[i] = 1 / max(deg_in(i), 1).
    """
    src, dst = edge_index[0], edge_index[1]
    w = edge_mask.astype(jnp.float32)
    counts = jnp.zeros((num_nodes, num_nodes), jnp.float32).at[dst, src].add(w)
    deg = jnp.sum(counts, axis=1, keepdims=True)
    invdeg = 1.0 / jnp.maximum(deg, 1.0)
    return counts.astype(jnp.int8), invdeg


def init_params(key, in_channels, out_channels):
    H = 2 * out_channels
    F5 = 5 * H

    def glorot(k, shape):
        fan_in, fan_out = shape[-2], shape[-1]
        lim = (6.0 / (fan_in + fan_out)) ** 0.5
        return jax.random.uniform(k, shape, jnp.float32, -lim, lim)

    ks = jax.random.split(key, 8)
    return {
        # 5 relation SAGEConvs, stacked; weights stored transposed (C, H)
        "wl": glorot(ks[0], (5, in_channels, H)),
        "wr": glorot(ks[1], (5, in_channels, H)),
        "bl": 0.01 * jax.random.normal(ks[2], (5, 1, H), jnp.float32),
        # BatchNorm1d(5*2*out_channels) running stats / affine params
        "gamma": jnp.ones((1, F5), jnp.float32),
        "beta": jnp.zeros((1, F5), jnp.float32),
        "rmean": jnp.zeros((1, F5), jnp.float32),
        "rvar": jnp.ones((1, F5), jnp.float32),
        # conv_mu / conv_logvar
        "wmul": glorot(ks[3], (F5, out_channels)),
        "wmur": glorot(ks[4], (F5, out_channels)),
        "bmu": 0.01 * jax.random.normal(ks[5], (1, out_channels), jnp.float32),
        "wlvl": glorot(ks[6], (F5, out_channels)),
        "wlvr": glorot(ks[7], (F5, out_channels)),
        "blv": jnp.zeros((1, out_channels), jnp.float32),
    }


def reference_forward(x, adj5, adj_full, params):
    """Pure-JAX f32 reference (mirrors the PyTorch module in eval mode)."""
    branches = []
    for r in range(5):
        aggr = adj5[r] @ x
        h = aggr @ params["wl"][r] + x @ params["wr"][r] + params["bl"][r]
        branches.append(jnp.maximum(h, 0.0))
    h = jnp.concatenate(branches, axis=1)
    inv = jax.lax.rsqrt(params["rvar"] + BN_EPS)
    hbn = (h - params["rmean"]) * inv * params["gamma"] + params["beta"]
    aggr2 = adj_full @ hbn
    mu = aggr2 @ params["wmul"] + hbn @ params["wmur"] + params["bmu"]
    lv = aggr2 @ params["wlvl"] + hbn @ params["wlvr"] + params["blv"]
    return mu, lv


if __name__ == "__main__":
    N = 200           # number of graph nodes (exercises padding: 200 -> 256)
    IN_CHANNELS = 16
    OUT_CHANNELS = 8
    E = 1200          # number of edges

    key = jax.random.PRNGKey(0)
    kx, ke, ka, kp = jax.random.split(key, 4)

    x = jax.random.normal(kx, (N, IN_CHANNELS), jnp.float32)
    edge_index = jax.random.randint(ke, (2, E), 0, N, jnp.int32)
    edge_attr = jax.random.randint(ka, (E,), 0, 5, jnp.int32)

    params = init_params(kp, IN_CHANNELS, OUT_CHANNELS)

    # per-relation and full-graph incoming-edge counts + 1/deg vectors
    c5, d5 = [], []
    for r in range(5):
        c, d = build_count_adj(edge_index, edge_attr == r, N)
        c5.append(c)
        d5.append(d)
    counts5 = jnp.stack(c5, 0)                          # (5, N, N) int8
    invdeg5 = jnp.stack(d5, 0)                          # (5, N, 1) f32
    counts_full, invdeg_full = build_count_adj(
        edge_index, jnp.ones((E,), jnp.bool_), N)

    # row_block=64 exercises the multi-tile + node-padding path at this tiny N;
    # at production sizes the default (VMEM-budgeted, up to 256) is preferred.
    mu, logvar = encoder_vgae_forward(x, counts5, invdeg5, counts_full,
                                      invdeg_full, params, row_block=64)
    jax.block_until_ready((mu, logvar))

    # f32 reference on the normalized dense adjacencies
    adj5_f32 = counts5.astype(jnp.float32) * invdeg5
    adjf_f32 = counts_full.astype(jnp.float32) * invdeg_full
    mu_ref, lv_ref = reference_forward(x, adj5_f32, adjf_f32, params)

    assert mu.shape == (N, OUT_CHANNELS) and logvar.shape == (N, OUT_CHANNELS)
    assert jnp.all(jnp.isfinite(mu)) and jnp.all(jnp.isfinite(logvar))
    # loose tolerance: x@wl and hbn carried in bfloat16 inside the kernels
    assert jnp.allclose(mu, mu_ref, rtol=1e-1, atol=1e-1)
    assert jnp.allclose(logvar, lv_ref, rtol=1e-1, atol=1e-1)
    print("KERNEL_OK")
</pallas_src>

<mosaic_0001>
module attributes {stable_mosaic.version = 11 : i64} {
  func.func @relconv_bn_kernel(%arg0: i32, %arg1: memref<5x64x256xi8, #tpu.memory_space<vmem>>, %arg2: memref<5x64x1xf32, #tpu.memory_space<vmem>>, %arg3: memref<256x128xbf16, #tpu.memory_space<vmem>>, %arg4: memref<64x16xf32, #tpu.memory_space<vmem>>, %arg5: memref<16x128xf32, #tpu.memory_space<vmem>>, %arg6: memref<1x128xf32, #tpu.memory_space<vmem>>, %arg7: memref<1x128xf32, #tpu.memory_space<vmem>>, %arg8: memref<1x128xf32, #tpu.memory_space<vmem>>, %arg9: memref<64x128xbf16, #tpu.memory_space<vmem>>) attributes {dimension_semantics = [#tpu.dimension_semantics<parallel>], iteration_bounds = array<i64: 4>, scalar_prefetch = 0 : i64, scratch_operands = 0 : i64, tpu.core_type = #tpu.core_type<tc>, window_params = [{transform_indices = @transform_0, window_bounds = array<i64: 5, 64, 256>}, {transform_indices = @transform_1, window_bounds = array<i64: 5, 64, 1>}, {pipeline_mode = #tpu.pipeline_mode<synchronous>, transform_indices = @transform_2, window_bounds = array<i64: 256, 128>}, {transform_indices = @transform_3, window_bounds = array<i64: 64, 16>}, {pipeline_mode = #tpu.pipeline_mode<synchronous>, transform_indices = @transform_4, window_bounds = array<i64: 16, 128>}, {pipeline_mode = #tpu.pipeline_mode<synchronous>, transform_indices = @transform_5, window_bounds = array<i64: 1, 128>}, {pipeline_mode = #tpu.pipeline_mode<synchronous>, transform_indices = @transform_6, window_bounds = array<i64: 1, 128>}, {pipeline_mode = #tpu.pipeline_mode<synchronous>, transform_indices = @transform_7, window_bounds = array<i64: 1, 128>}, {transform_indices = @transform_8, window_bounds = array<i64: 64, 128>}]} {
    %c0 = arith.constant 0 : index
    %c0_0 = arith.constant 0 : index
    %0 = vector.load %arg4[%c0, %c0_0] : memref<64x16xf32, #tpu.memory_space<vmem>>, vector<64x16xf32>
    %c0_1 = arith.constant 0 : index
    %c0_2 = arith.constant 0 : index
    %1 = vector.load %arg5[%c0_1, %c0_2] : memref<16x128xf32, #tpu.memory_space<vmem>>, vector<16x128xf32>
    %cst = arith.constant dense<0.000000e+00> : vector<64x128xf32>
    %2 = tpu.matmul %0, %1, %cst {dimension_numbers = #tpu.dot_dimension_numbers<[1], [0], [0], [1], [0, 0, 1, 1], [], []>} : vector<64x16xf32>, vector<16x128xf32>, vector<64x128xf32> -> vector<64x128xf32>
    %3 = tpu.iota {dimensions = array<i32: 1>} : vector<64x128xi32>
    %c0_3 = arith.constant 0 : index
    %c0_4 = arith.constant 0 : index
    %c0_5 = arith.constant 0 : index
    %4 = vector.load %arg1[%c0_3, %c0_4, %c0_5] : memref<5x64x256xi8, #tpu.memory_space<vmem>>, vector<1x64x256xi8>
    %5 = vector.shape_cast %4 : vector<1x64x256xi8> to vector<64x256xi8>
    %6 = arith.sitofp %5 : vector<64x256xi8> to vector<64x256xf32>
    %7 = arith.truncf %6 : vector<64x256xf32> to vector<64x256xbf16>
    %c0_6 = arith.constant 0 : index
    %c0_7 = arith.constant 0 : index
    %8 = vector.load %arg3[%c0_6, %c0_7] : memref<256x128xbf16, #tpu.memory_space<vmem>>, vector<256x128xbf16>
    %cst_8 = arith.constant dense<0.000000e+00> : vector<64x128xf32>
    %9 = tpu.matmul %7, %8, %cst_8 {dimension_numbers = #tpu.dot_dimension_numbers<[1], [0], [0], [1], [0, 0, 1, 1], [], []>} : vector<64x256xbf16>, vector<256x128xbf16>, vector<64x128xf32> -> vector<64x128xf32>
    %c0_9 = arith.constant 0 : index
    %c0_10 = arith.constant 0 : index
    %c0_11 = arith.constant 0 : index
    %10 = vector.load %arg2[%c0_9, %c0_10, %c0_11] : memref<5x64x1xf32, #tpu.memory_space<vmem>>, vector<1x64x1xf32>
    %11 = vector.shape_cast %10 : vector<1x64x1xf32> to vector<64x1xf32>
    %12 = vector.broadcast %11 : vector<64x1xf32> to vector<64x128xf32>
    %13 = arith.mulf %9, %12 : vector<64x128xf32>
    %c0_i32 = arith.constant 0 : i32
    %14 = vector.broadcast %c0_i32 : i32 to vector<64x128xi32>
    %15 = arith.cmpi sge, %3, %14 : vector<64x128xi32>
    %c16_i32 = arith.constant 16 : i32
    %16 = vector.broadcast %c16_i32 : i32 to vector<64x128xi32>
    %17 = arith.cmpi slt, %3, %16 : vector<64x128xi32>
    %18 = arith.andi %15, %17 : vector<64x128xi1>
    %cst_12 = arith.constant 0.000000e+00 : f32
    %19 = vector.broadcast %cst_12 : f32 to vector<64x128xf32>
    %20 = arith.select %18, %13, %19 : vector<64x128xi1>, vector<64x128xf32>
    %21 = arith.addf %2, %20 : vector<64x128xf32>
    %c1 = arith.constant 1 : index
    %c0_13 = arith.constant 0 : index
    %c0_14 = arith.constant 0 : index
    %22 = vector.load %arg1[%c1, %c0_13, %c0_14] : memref<5x64x256xi8, #tpu.memory_space<vmem>>, vector<1x64x256xi8>
    %23 = vector.shape_cast %22 : vector<1x64x256xi8> to vector<64x256xi8>
    %24 = arith.sitofp %23 : vector<64x256xi8> to vector<64x256xf32>
    %25 = arith.truncf %24 : vector<64x256xf32> to vector<64x256xbf16>
    %c0_15 = arith.constant 0 : index
    %c0_16 = arith.constant 0 : index
    %26 = vector.load %arg3[%c0_15, %c0_16] : memref<256x128xbf16, #tpu.memory_space<vmem>>, vector<256x128xbf16>
    %cst_17 = arith.constant dense<0.000000e+00> : vector<64x128xf32>
    %27 = tpu.matmul %25, %26, %cst_17 {dimension_numbers = #tpu.dot_dimension_numbers<[1], [0], [0], [1], [0, 0, 1, 1], [], []>} : vector<64x256xbf16>, vector<256x128xbf16>, vector<64x128xf32> -> vector<64x128xf32>
    %c1_18 = arith.constant 1 : index
    %c0_19 = arith.constant 0 : index
    %c0_20 = arith.constant 0 : index
    %28 = vector.load %arg2[%c1_18, %c0_19, %c0_20] : memref<5x64x1xf32, #tpu.memory_space<vmem>>, vector<1x64x1xf32>
    %29 = vector.shape_cast %28 : vector<1x64x1xf32> to vector<64x1xf32>
    %30 = vector.broadcast %29 : vector<64x1xf32> to vector<64x128xf32>
    %31 = arith.mulf %27, %30 : vector<64x128xf32>
    %c16_i32_21 = arith.constant 16 : i32
    %32 = vector.broadcast %c16_i32_21 : i32 to vector<64x128xi32>
    %33 = arith.cmpi sge, %3, %32 : vector<64x128xi32>
    %c32_i32 = arith.constant 32 : i32
    %34 = vector.broadcast %c32_i32 : i32 to vector<64x128xi32>
    %35 = arith.cmpi slt, %3, %34 : vector<64x128xi32>
    %36 = arith.andi %33, %35 : vector<64x128xi1>
    %cst_22 = arith.constant 0.000000e+00 : f32
    %37 = vector.broadcast %cst_22 : f32 to vector<64x128xf32>
    %38 = arith.select %36, %31, %37 : vector<64x128xi1>, vector<64x128xf32>
    %39 = arith.addf %21, %38 : vector<64x128xf32>
    %c2 = arith.constant 2 : index
    %c0_23 = arith.constant 0 : index
    %c0_24 = arith.constant 0 : index
    %40 = vector.load %arg1[%c2, %c0_23, %c0_24] : memref<5x64x256xi8, #tpu.memory_space<vmem>>, vector<1x64x256xi8>
    %41 = vector.shape_cast %40 : vector<1x64x256xi8> to vector<64x256xi8>
    %42 = arith.sitofp %41 : vector<64x256xi8> to vector<64x256xf32>
    %43 = arith.truncf %42 : vector<64x256xf32> to vector<64x256xbf16>
    %c0_25 = arith.constant 0 : index
    %c0_26 = arith.constant 0 : index
    %44 = vector.load %arg3[%c0_25, %c0_26] : memref<256x128xbf16, #tpu.memory_space<vmem>>, vector<256x128xbf16>
    %cst_27 = arith.constant dense<0.000000e+00> : vector<64x128xf32>
    %45 = tpu.matmul %43, %44, %cst_27 {dimension_numbers = #tpu.dot_dimension_numbers<[1], [0], [0], [1], [0, 0, 1, 1], [], []>} : vector<64x256xbf16>, vector<256x128xbf16>, vector<64x128xf32> -> vector<64x128xf32>
    %c2_28 = arith.constant 2 : index
    %c0_29 = arith.constant 0 : index
    %c0_30 = arith.constant 0 : index
    %46 = vector.load %arg2[%c2_28, %c0_29, %c0_30] : memref<5x64x1xf32, #tpu.memory_space<vmem>>, vector<1x64x1xf32>
    %47 = vector.shape_cast %46 : vector<1x64x1xf32> to vector<64x1xf32>
    %48 = vector.broadcast %47 : vector<64x1xf32> to vector<64x128xf32>
    %49 = arith.mulf %45, %48 : vector<64x128xf32>
    %c32_i32_31 = arith.constant 32 : i32
    %50 = vector.broadcast %c32_i32_31 : i32 to vector<64x128xi32>
    %51 = arith.cmpi sge, %3, %50 : vector<64x128xi32>
    %c48_i32 = arith.constant 48 : i32
    %52 = vector.broadcast %c48_i32 : i32 to vector<64x128xi32>
    %53 = arith.cmpi slt, %3, %52 : vector<64x128xi32>
    %54 = arith.andi %51, %53 : vector<64x128xi1>
    %cst_32 = arith.constant 0.000000e+00 : f32
    %55 = vector.broadcast %cst_32 : f32 to vector<64x128xf32>
    %56 = arith.select %54, %49, %55 : vector<64x128xi1>, vector<64x128xf32>
    %57 = arith.addf %39, %56 : vector<64x128xf32>
    %c3 = arith.constant 3 : index
    %c0_33 = arith.constant 0 : index
    %c0_34 = arith.constant 0 : index
    %58 = vector.load %arg1[%c3, %c0_33, %c0_34] : memref<5x64x256xi8, #tpu.memory_space<vmem>>, vector<1x64x256xi8>
    %59 = vector.shape_cast %58 : vector<1x64x256xi8> to vector<64x256xi8>
    %60 = arith.sitofp %59 : vector<64x256xi8> to vector<64x256xf32>
    %61 = arith.truncf %60 : vector<64x256xf32> to vector<64x256xbf16>
    %c0_35 = arith.constant 0 : index
    %c0_36 = arith.constant 0 : index
    %62 = vector.load %arg3[%c0_35, %c0_36] : memref<256x128xbf16, #tpu.memory_space<vmem>>, vector<256x128xbf16>
    %cst_37 = arith.constant dense<0.000000e+00> : vector<64x128xf32>
    %63 = tpu.matmul %61, %62, %cst_37 {dimension_numbers = #tpu.dot_dimension_numbers<[1], [0], [0], [1], [0, 0, 1, 1], [], []>} : vector<64x256xbf16>, vector<256x128xbf16>, vector<64x128xf32> -> vector<64x128xf32>
    %c3_38 = arith.constant 3 : index
    %c0_39 = arith.constant 0 : index
    %c0_40 = arith.constant 0 : index
    %64 = vector.load %arg2[%c3_38, %c0_39, %c0_40] : memref<5x64x1xf32, #tpu.memory_space<vmem>>, vector<1x64x1xf32>
    %65 = vector.shape_cast %64 : vector<1x64x1xf32> to vector<64x1xf32>
    %66 = vector.broadcast %65 : vector<64x1xf32> to vector<64x128xf32>
    %67 = arith.mulf %63, %66 : vector<64x128xf32>
    %c48_i32_41 = arith.constant 48 : i32
    %68 = vector.broadcast %c48_i32_41 : i32 to vector<64x128xi32>
    %69 = arith.cmpi sge, %3, %68 : vector<64x128xi32>
    %c64_i32 = arith.constant 64 : i32
    %70 = vector.broadcast %c64_i32 : i32 to vector<64x128xi32>
    %71 = arith.cmpi slt, %3, %70 : vector<64x128xi32>
    %72 = arith.andi %69, %71 : vector<64x128xi1>
    %cst_42 = arith.constant 0.000000e+00 : f32
    %73 = vector.broadcast %cst_42 : f32 to vector<64x128xf32>
    %74 = arith.select %72, %67, %73 : vector<64x128xi1>, vector<64x128xf32>
    %75 = arith.addf %57, %74 : vector<64x128xf32>
    %c4 = arith.constant 4 : index
    %c0_43 = arith.constant 0 : index
    %c0_44 = arith.constant 0 : index
    %76 = vector.load %arg1[%c4, %c0_43, %c0_44] : memref<5x64x256xi8, #tpu.memory_space<vmem>>, vector<1x64x256xi8>
    %77 = vector.shape_cast %76 : vector<1x64x256xi8> to vector<64x256xi8>
    %78 = arith.sitofp %77 : vector<64x256xi8> to vector<64x256xf32>
    %79 = arith.truncf %78 : vector<64x256xf32> to vector<64x256xbf16>
    %c0_45 = arith.constant 0 : index
    %c0_46 = arith.constant 0 : index
    %80 = vector.load %arg3[%c0_45, %c0_46] : memref<256x128xbf16, #tpu.memory_space<vmem>>, vector<256x128xbf16>
    %cst_47 = arith.constant dense<0.000000e+00> : vector<64x128xf32>
    %81 = tpu.matmul %79, %80, %cst_47 {dimension_numbers = #tpu.dot_dimension_numbers<[1], [0], [0], [1], [0, 0, 1, 1], [], []>} : vector<64x256xbf16>, vector<256x128xbf16>, vector<64x128xf32> -> vector<64x128xf32>
    %c4_48 = arith.constant 4 : index
    %c0_49 = arith.constant 0 : index
    %c0_50 = arith.constant 0 : index
    %82 = vector.load %arg2[%c4_48, %c0_49, %c0_50] : memref<5x64x1xf32, #tpu.memory_space<vmem>>, vector<1x64x1xf32>
    %83 = vector.shape_cast %82 : vector<1x64x1xf32> to vector<64x1xf32>
    %84 = vector.broadcast %83 : vector<64x1xf32> to vector<64x128xf32>
    %85 = arith.mulf %81, %84 : vector<64x128xf32>
    %c64_i32_51 = arith.constant 64 : i32
    %86 = vector.broadcast %c64_i32_51 : i32 to vector<64x128xi32>
    %87 = arith.cmpi sge, %3, %86 : vector<64x128xi32>
    %c80_i32 = arith.constant 80 : i32
    %88 = vector.broadcast %c80_i32 : i32 to vector<64x128xi32>
    %89 = arith.cmpi slt, %3, %88 : vector<64x128xi32>
    %90 = arith.andi %87, %89 : vector<64x128xi1>
    %cst_52 = arith.constant 0.000000e+00 : f32
    %91 = vector.broadcast %cst_52 : f32 to vector<64x128xf32>
    %92 = arith.select %90, %85, %91 : vector<64x128xi1>, vector<64x128xf32>
    %93 = arith.addf %75, %92 : vector<64x128xf32>
    %c0_53 = arith.constant 0 : index
    %c0_54 = arith.constant 0 : index
    %94 = vector.load %arg6[%c0_53, %c0_54] : memref<1x128xf32, #tpu.memory_space<vmem>>, vector<1x128xf32>
    %95 = vector.broadcast %94 : vector<1x128xf32> to vector<64x128xf32>
    %96 = arith.addf %93, %95 : vector<64x128xf32>
    %cst_55 = arith.constant 0.000000e+00 : f32
    %97 = vector.broadcast %cst_55 : f32 to vector<64x128xf32>
    %98 = arith.maximumf %96, %97 : vector<64x128xf32>
    %c0_56 = arith.constant 0 : index
    %c0_57 = arith.constant 0 : index
    %99 = vector.load %arg7[%c0_56, %c0_57] : memref<1x128xf32, #tpu.memory_space<vmem>>, vector<1x128xf32>
    %100 = vector.broadcast %99 : vector<1x128xf32> to vector<64x128xf32>
    %101 = arith.mulf %98, %100 : vector<64x128xf32>
    %c0_58 = arith.constant 0 : index
    %c0_59 = arith.constant 0 : index
    %102 = vector.load %arg8[%c0_58, %c0_59] : memref<1x128xf32, #tpu.memory_space<vmem>>, vector<1x128xf32>
    %103 = vector.broadcast %102 : vector<1x128xf32> to vector<64x128xf32>
    %104 = arith.addf %101, %103 : vector<64x128xf32>
    %105 = arith.truncf %104 : vector<64x128xf32> to vector<64x128xbf16>
    %c0_60 = arith.constant 0 : index
    %c0_61 = arith.constant 0 : index
    %106 = vector.load %arg9[%c0_60, %c0_61] : memref<64x128xbf16, #tpu.memory_space<vmem>>, vector<64x128xbf16>
    tpu.vector_store %arg9[%c0_60, %c0_61], %105 {strides = array<i32>} : memref<64x128xbf16, #tpu.memory_space<vmem>>, vector<64x128xbf16>,
    return
  }
  func.func @transform_0(%arg0: i32) -> (i32, i32, i32) {
    %c0_i32 = arith.constant 0 : i32
    %c0_i32_0 = arith.constant 0 : i32
    %c0_i32_1 = arith.constant 0 : i32
    return %c0_i32, %arg0, %c0_i32_0 : i32, i32, i32
  }
  func.func @transform_1(%arg0: i32) -> (i32, i32, i32) {
    %c0_i32 = arith.constant 0 : i32
    %c0_i32_0 = arith.constant 0 : i32
    %c0_i32_1 = arith.constant 0 : i32
    return %c0_i32, %arg0, %c0_i32_0 : i32, i32, i32
  }
  func.func @transform_2(%arg0: i32) -> (i32, i32) {
    %c0_i32 = arith.constant 0 : i32
    %c0_i32_0 = arith.constant 0 : i32
    %c0_i32_1 = arith.constant 0 : i32
    return %c0_i32, %c0_i32_0 : i32, i32
  }
  func.func @transform_3(%arg0: i32) -> (i32, i32) {
    %c0_i32 = arith.constant 0 : i32
    %c0_i32_0 = arith.constant 0 : i32
    return %arg0, %c0_i32 : i32, i32
  }
  func.func @transform_4(%arg0: i32) -> (i32, i32) {
    %c0_i32 = arith.constant 0 : i32
    %c0_i32_0 = arith.constant 0 : i32
    %c0_i32_1 = arith.constant 0 : i32
    return %c0_i32, %c0_i32_0 : i32, i32
  }
  func.func @transform_5(%arg0: i32) -> (i32, i32) {
    %c0_i32 = arith.constant 0 : i32
    %c0_i32_0 = arith.constant 0 : i32
    %c0_i32_1 = arith.constant 0 : i32
    return %c0_i32, %c0_i32_0 : i32, i32
  }
  func.func @transform_6(%arg0: i32) -> (i32, i32) {
    %c0_i32 = arith.constant 0 : i32
    %c0_i32_0 = arith.constant 0 : i32
    %c0_i32_1 = arith.constant 0 : i32
    return %c0_i32, %c0_i32_0 : i32, i32
  }
  func.func @transform_7(%arg0: i32) -> (i32, i32) {
    %c0_i32 = arith.constant 0 : i32
    %c0_i32_0 = arith.constant 0 : i32
    %c0_i32_1 = arith.constant 0 : i32
    return %c0_i32, %c0_i32_0 : i32, i32
  }
  func.func @transform_8(%arg0: i32) -> (i32, i32) {
    %c0_i32 = arith.constant 0 : i32
    %c0_i32_0 = arith.constant 0 : i32
    return %arg0, %c0_i32 : i32, i32
  }
}

</mosaic_0001>

<bundles_post_ra>
// kernel: tpu_custom_call.1
= control target key start
LH: loop header
LB: loop body
LE: loop exit
PB: predicated region body
PF: predicated region fallthrough
CT: control target
= control target key end

     0   :  { %13 = vsyncpa [#allocation5], 0  ;;  %s3209_s0 = inlined_call_operand.vmem [shape: s8[5,256,256], index: 0, kind: input, shape index: {}]   ;;  %s3210_s1 = inlined_call_operand.vmem [shape: f32[5,256,1], index: 1, kind: input, shape index: {}]   ;;  %s3211_s2 = inlined_call_operand.vmem [shape: bf16[256,128], index: 2, kind: input, shape index: {}]   ;;  %s3212_s3 = inlined_call_operand.vmem [shape: f32[256,16], index: 3, kind: input, shape index: {}]   ;;  %s3213_s4 = inlined_call_operand.vmem [shape: f32[16,128], index: 4, kind: input, shape index: {}]   ;;  %s3214_s5 = inlined_call_operand.vmem [shape: f32[1,128], index: 5, kind: input, shape index: {}]   ;;  %s3215_s6 = inlined_call_operand.vmem [shape: f32[1,128], index: 6, kind: input, shape index: {}]   ;;  %s3216_s7 = inlined_call_operand.vmem [shape: f32[1,128], index: 7, kind: input, shape index: {}]   ;;  %s3217_s8 = inlined_call_operand.hbm [shape: bf16[256,128], index: 8, kind: output, shape index: {}]  }
   0x1   :  { %15 = vsyncpa [#allocation5 + $0x1], 0  ;;  %s2393_s27 = smov 0   ;;  %s2395_s28 = smov 0  }
   0x2   :  { %s2397_s29 = smov 0   ;;  %s2399_s30 = smov 0  }
   0x3 LB: > { %s2414_s9 = sadd.s32 4294967295, %s2342_s30   ;;  %s1835_s10 = sadd.s32 4294967294, %s2342_s30   ;;  %s2342_s30 = sphi %s2399_s30, %s3232_s30   ;;  %s2338_s29 = sphi %s2397_s29, %s3231_s29   ;;  %s2334_s28 = sphi %s2395_s28, %s3230_s28   ;;  %s2330_s27 = sphi %s2393_s27, %s3229_s27  }
   0x4   : > { %s2418_s11 = sadd.s32 1, %s2342_s30   ;;  %s28_s12 = sadd.s32 1, %s2338_s29 }
   0x5   : > { %s25_s13 = ssub.s32 %s2342_s30, %s2418_s11  ;;  %p35_p0 = scmp.ne.s32.totalorder %s2338_s29, %s2334_s28 }
   0x6   : > { %p26_p1 = scmp.eq.s32.totalorder %s25_s13, 0  ;;  %p36_p2 = scmp.eq.s32.totalorder %s2342_s30, 0 }
   0x7   : > { %p222_p3 = scmp.eq.s32.totalorder %s2414_s9, 3  ;;  %p227_p4 = scmp.ne.s32.totalorder %s2334_s28, %s2330_s27 }
   0x8   : > { %s2430_s14 = scalar_select %p26_p1, %s2338_s29, %s28_s12  }
   0x9   : > { %p2432_p5 = por %p36_p2, %p35_p0  ;;  %p2436_p6 = por %p222_p3, %p35_p0 }
   0xa   : > { %p228_p7 = scmp.eq.s32.totalorder %s1835_s10, 3  ;;  %p1837_p9 = scmp.ge.s32.totalorder %s2342_s30, 4 }
   0xc   : > { %p2440_p8 = por %p228_p7, %p227_p4  ;;  %259 = sbr.rel (%p1837_p9) target bundleno = 59 (0x3b), region = 36 }
  0x13   : > { %262 = sbr.rel (!%p2432_p5) target bundleno = 34 (0x22), region = 40  ;;  %s264_s18 = sand.u32 (%p2432_p5), 1, %s2338_s29  }
  0x14   : > { %s1936_s19 = sshll.u32 (%p2432_p5), %s2342_s30, 5  ;;  %s2216_s20 = smul.u32 (%p2432_p5), 160, %s264_s18 }
  0x15   : > { %s2452_s23 = scalar_lea.vmem (%p2432_p5), %s3209_s0, %s1936_s19 }
  0x16   : > { %v283_v0 = vld [vmem:[%s2452_s23] sm:$0xff] (%p2432_p5)  ;;  %v285_v1 = vld [vmem:[%s2452_s23 + $0x8] sm:$0xff] (%p2432_p5)  ;;  %v287_v2 = vld [vmem:[%s2452_s23 + $0x10] sm:$0xff] (%p2432_p5)  ;;  %s2460_s24 = scalar_lea.vmem (%p2432_p5), [#allocation2], %s2216_s20 }
  0x17   : > { %v289_v3 = vld [vmem:[%s2452_s23 + $0x18] sm:$0xff] (%p2432_p5)  ;;  %v291_v4 = vld [vmem:[%s2452_s23 + $0x80] sm:$0xff] (%p2432_p5)  ;;  %v293_v5 = vld [vmem:[%s2452_s23 + $0x88] sm:$0xff] (%p2432_p5)  ;;  %284 = vst [vmem:[%s2460_s24] sm:$0xff] (%p2432_p5), %v283_v0 }
  0x18   : > { %286 = vst [vmem:[%s2460_s24 + $0x8] sm:$0xff] (%p2432_p5), %v285_v1  ;;  %288 = vst [vmem:[%s2460_s24 + $0x10] sm:$0xff] (%p2432_p5), %v287_v2  ;;  %v295_v6 = vld [vmem:[%s2452_s23 + $0x90] sm:$0xff] (%p2432_p5)  ;;  %v297_v7 = vld [vmem:[%s2452_s23 + $0x98] sm:$0xff] (%p2432_p5) }
  0x19   : > { %290 = vst [vmem:[%s2460_s24 + $0x18] sm:$0xff] (%p2432_p5), %v289_v3  ;;  %292 = vst [vmem:[%s2460_s24 + $0x20] sm:$0xff] (%p2432_p5), %v291_v4  ;;  %v299_v8 = vld [vmem:[%s2452_s23 + $0x100] sm:$0xff] (%p2432_p5)  ;;  %v301_v9 = vld [vmem:[%s2452_s23 + $0x108] sm:$0xff] (%p2432_p5) }
  0x1a   : > { %294 = vst [vmem:[%s2460_s24 + $0x28] sm:$0xff] %v293_v5  ;;  %296 = vst [vmem:[%s2460_s24 + $0x30] sm:$0xff] %v295_v6  ;;  %v303_v10 = vld [vmem:[%s2452_s23 + $0x110] sm:$0xff]  ;;  %v305_v11 = vld [vmem:[%s2452_s23 + $0x118] sm:$0xff] }
  0x1b   : > { %298 = vst [vmem:[%s2460_s24 + $0x38] sm:$0xff] %v297_v7  ;;  %300 = vst [vmem:[%s2460_s24 + $0x40] sm:$0xff] %v299_v8  ;;  %v307_v12 = vld [vmem:[%s2452_s23 + $0x180] sm:$0xff]  ;;  %v309_v13 = vld [vmem:[%s2452_s23 + $0x188] sm:$0xff] }
  0x1c   : > { %302 = vst [vmem:[%s2460_s24 + $0x48] sm:$0xff] %v301_v9  ;;  %304 = vst [vmem:[%s2460_s24 + $0x50] sm:$0xff] %v303_v10  ;;  %v311_v14 = vld [vmem:[%s2452_s23 + $0x190] sm:$0xff]  ;;  %v313_v15 = vld [vmem:[%s2452_s23 + $0x198] sm:$0xff] }
  0x1d   : > { %306 = vst [vmem:[%s2460_s24 + $0x58] sm:$0xff] %v305_v11  ;;  %308 = vst [vmem:[%s2460_s24 + $0x60] sm:$0xff] %v307_v12  ;;  %v315_v16 = vld [vmem:[%s2452_s23 + $0x200] sm:$0xff]  ;;  %v317_v17 = vld [vmem:[%s2452_s23 + $0x208] sm:$0xff] }
  0x1e   : > { %310 = vst [vmem:[%s2460_s24 + $0x68] sm:$0xff] %v309_v13  ;;  %312 = vst [vmem:[%s2460_s24 + $0x70] sm:$0xff] %v311_v14  ;;  %v319_v18 = vld [vmem:[%s2452_s23 + $0x210] sm:$0xff]  ;;  %v321_v19 = vld [vmem:[%s2452_s23 + $0x218] sm:$0xff] }
  0x1f   : > { %314 = vst [vmem:[%s2460_s24 + $0x78] sm:$0xff] %v313_v15  ;;  %316 = vst [vmem:[%s2460_s24 + $0x80] sm:$0xff] %v315_v16 }
  0x20   : > { %318 = vst [vmem:[%s2460_s24 + $0x88] sm:$0xff] %v317_v17  ;;  %320 = vst [vmem:[%s2460_s24 + $0x90] sm:$0xff] %v319_v18 }
  0x21   : > { %322 = vst [vmem:[%s2460_s24 + $0x98] sm:$0xff] %v321_v19 }
  0x22 PF: > { %328 = sbr.rel (!%p2432_p5) target bundleno = 59 (0x3b), region = 63  ;;  %s330_s25 = sand.u32 (%p2432_p5), 1, %s2338_s29  }
  0x23   : > { %s1937_s26 = sshll.u32 (%p2432_p5), %s2342_s30, 6  ;;  %s2217_s10 = smul.u32 (%p2432_p5), 320, %s330_s25 }
  0x24   : > { %s2503_s18 = scalar_lea.vmem (%p2432_p5), %s3210_s1, %s1937_s26 }
  0x25   : > { %v441_v20 = vld [vmem:[%s2503_s18] sm:$0xff] (%p2432_p5)  ;;  %v443_v21 = vld [vmem:[%s2503_s18 + $0x8] sm:$0xff] (%p2432_p5)  ;;  %v445_v22 = vld [vmem:[%s2503_s18 + $0x10] sm:$0xff] (%p2432_p5)  ;;  %s2511_s15 = scalar_lea.vmem (%p2432_p5), [#allocation3], %s2217_s10 }
  0x26   : > { %v447_v23 = vld [vmem:[%s2503_s18 + $0x18] sm:$0xff] (%p2432_p5)  ;;  %v449_v24 = vld [vmem:[%s2503_s18 + $0x20] sm:$0xff] (%p2432_p5)  ;;  %v451_v25 = vld [vmem:[%s2503_s18 + $0x28] sm:$0xff] (%p2432_p5)  ;;  %442 = vst [vmem:[%s2511_s15] sm:$0xff] (%p2432_p5), %v441_v20 }
  0x27   : > { %444 = vst [vmem:[%s2511_s15 + $0x8] sm:$0xff] (%p2432_p5), %v443_v21  ;;  %446 = vst [vmem:[%s2511_s15 + $0x10] sm:$0xff] (%p2432_p5), %v445_v22  ;;  %v453_v26 = vld [vmem:[%s2503_s18 + $0x30] sm:$0xff] (%p2432_p5)  ;;  %v455_v27 = vld [vmem:[%s2503_s18 + $0x38] sm:$0xff] (%p2432_p5) }
  0x28   : > { %448 = vst [vmem:[%s2511_s15 + $0x18] sm:$0xff] (%p2432_p5), %v447_v23  ;;  %450 = vst [vmem:[%s2511_s15 + $0x20] sm:$0xff] (%p2432_p5), %v449_v24  ;;  %v457_v28 = vld [vmem:[%s2503_s18 + $0x100] sm:$0xff] (%p2432_p5)  ;;  %v459_v29 = vld [vmem:[%s2503_s18 + $0x108] sm:$0xff] (%p2432_p5) }
  0x29   : > { %452 = vst [vmem:[%s2511_s15 + $0x28] sm:$0xff] %v451_v25  ;;  %454 = vst [vmem:[%s2511_s15 + $0x30] sm:$0xff] %v453_v26  ;;  %v461_v30 = vld [vmem:[%s2503_s18 + $0x110] sm:$0xff]  ;;  %v463_v31 = vld [vmem:[%s2503_s18 + $0x118] sm:$0xff] }
  0x2a   : > { %456 = vst [vmem:[%s2511_s15 + $0x38] sm:$0xff] %v455_v27  ;;  %458 = vst [vmem:[%s2511_s15 + $0x40] sm:$0xff] %v457_v28  ;;  %v465_v32 = vld [vmem:[%s2503_s18 + $0x120] sm:$0xff]  ;;  %v467_v33 = vld [vmem:[%s2503_s18 + $0x128] sm:$0xff] }
  0x2b   : > { %460 = vst [vmem:[%s2511_s15 + $0x48] sm:$0xff] %v459_v29  ;;  %462 = vst [vmem:[%s2511_s15 + $0x50] sm:$0xff] %v461_v30  ;;  %v469_v34 = vld [vmem:[%s2503_s18 + $0x130] sm:$0xff]  ;;  %v471_v35 = vld [vmem:[%s2503_s18 + $0x138] sm:$0xff] }
  0x2c   : > { %464 = vst [vmem:[%s2511_s15 + $0x58] sm:$0xff] %v463_v31  ;;  %466 = vst [vmem:[%s2511_s15 + $0x60] sm:$0xff] %v465_v32  ;;  %v473_v36 = vld [vmem:[%s2503_s18 + $0x200] sm:$0xff]  ;;  %v475_v37 = vld [vmem:[%s2503_s18 + $0x208] sm:$0xff] }
  0x2d   : > { %468 = vst [vmem:[%s2511_s15 + $0x68] sm:$0xff] %v467_v33  ;;  %470 = vst [vmem:[%s2511_s15 + $0x70] sm:$0xff] %v469_v34  ;;  %v477_v38 = vld [vmem:[%s2503_s18 + $0x210] sm:$0xff]  ;;  %v479_v39 = vld [vmem:[%s2503_s18 + $0x218] sm:$0xff] }
  0x2e   : > { %472 = vst [vmem:[%s2511_s15 + $0x78] sm:$0xff] %v471_v35  ;;  %474 = vst [vmem:[%s2511_s15 + $0x80] sm:$0xff] %v473_v36  ;;  %v481_v40 = vld [vmem:[%s2503_s18 + $0x220] sm:$0xff]  ;;  %v483_v41 = vld [vmem:[%s2503_s18 + $0x228] sm:$0xff] }
  0x2f   : > { %476 = vst [vmem:[%s2511_s15 + $0x88] sm:$0xff] %v475_v37  ;;  %478 = vst [vmem:[%s2511_s15 + $0x90] sm:$0xff] %v477_v38  ;;  %v485_v42 = vld [vmem:[%s2503_s18 + $0x230] sm:$0xff]  ;;  %v487_v43 = vld [vmem:[%s2503_s18 + $0x238] sm:$0xff] }
  0x30   : > { %480 = vst [vmem:[%s2511_s15 + $0x98] sm:$0xff] %v479_v39  ;;  %482 = vst [vmem:[%s2511_s15 + $0xa0] sm:$0xff] %v481_v40  ;;  %v489_v44 = vld [vmem:[%s2503_s18 + $0x300] sm:$0xff]  ;;  %v491_v45 = vld [vmem:[%s2503_s18 + $0x308] sm:$0xff] }
  0x31   : > { %484 = vst [vmem:[%s2511_s15 + $0xa8] sm:$0xff] %v483_v41  ;;  %486 = vst [vmem:[%s2511_s15 + $0xb0] sm:$0xff] %v485_v42  ;;  %v493_v46 = vld [vmem:[%s2503_s18 + $0x310] sm:$0xff]  ;;  %v495_v47 = vld [vmem:[%s2503_s18 + $0x318] sm:$0xff] }
  0x32   : > { %488 = vst [vmem:[%s2511_s15 + $0xb8] sm:$0xff] %v487_v43  ;;  %490 = vst [vmem:[%s2511_s15 + $0xc0] sm:$0xff] %v489_v44  ;;  %v497_v48 = vld [vmem:[%s2503_s18 + $0x320] sm:$0xff]  ;;  %v499_v49 = vld [vmem:[%s2503_s18 + $0x328] sm:$0xff] }
  0x33   : > { %492 = vst [vmem:[%s2511_s15 + $0xc8] sm:$0xff] %v491_v45  ;;  %494 = vst [vmem:[%s2511_s15 + $0xd0] sm:$0xff] %v493_v46  ;;  %v501_v50 = vld [vmem:[%s2503_s18 + $0x330] sm:$0xff]  ;;  %v503_v51 = vld [vmem:[%s2503_s18 + $0x338] sm:$0xff] }
  0x34   : > { %496 = vst [vmem:[%s2511_s15 + $0xd8] sm:$0xff] %v495_v47  ;;  %498 = vst [vmem:[%s2511_s15 + $0xe0] sm:$0xff] %v497_v48  ;;  %v505_v52 = vld [vmem:[%s2503_s18 + $0x400] sm:$0xff]  ;;  %v507_v53 = vld [vmem:[%s2503_s18 + $0x408] sm:$0xff] }
  0x35   : > { %500 = vst [vmem:[%s2511_s15 + $0xe8] sm:$0xff] %v499_v49  ;;  %502 = vst [vmem:[%s2511_s15 + $0xf0] sm:$0xff] %v501_v50  ;;  %v509_v54 = vld [vmem:[%s2503_s18 + $0x410] sm:$0xff]  ;;  %v511_v55 = vld [vmem:[%s2503_s18 + $0x418] sm:$0xff] }
  0x36   : > { %504 = vst [vmem:[%s2511_s15 + $0xf8] sm:$0xff] %v503_v51  ;;  %506 = vst [vmem:[%s2511_s15 + $0x100] sm:$0xff] %v505_v52  ;;  %v513_v56 = vld [vmem:[%s2503_s18 + $0x420] sm:$0xff]  ;;  %v515_v57 = vld [vmem:[%s2503_s18 + $0x428] sm:$0xff] }
  0x37   : > { %508 = vst [vmem:[%s2511_s15 + $0x108] sm:$0xff] %v507_v53  ;;  %510 = vst [vmem:[%s2511_s15 + $0x110] sm:$0xff] %v509_v54  ;;  %v517_v58 = vld [vmem:[%s2503_s18 + $0x430] sm:$0xff]  ;;  %v519_v59 = vld [vmem:[%s2503_s18 + $0x438] sm:$0xff] }
  0x38   : > { %512 = vst [vmem:[%s2511_s15 + $0x118] sm:$0xff] %v511_v55  ;;  %514 = vst [vmem:[%s2511_s15 + $0x120] sm:$0xff] %v513_v56 }
  0x39   : > { %516 = vst [vmem:[%s2511_s15 + $0x128] sm:$0xff] %v515_v57  ;;  %518 = vst [vmem:[%s2511_s15 + $0x130] sm:$0xff] %v517_v58 }
  0x3a   : > { %520 = vst [vmem:[%s2511_s15 + $0x138] sm:$0xff] %v519_v59 }
  0x3b PF: > { %p1843_p10 = scmp.ge.s32.totalorder %s2342_s30, 1  ;;  %p534_p11 = scmp.lt.s32.totalorder %s2342_s30, 5 }
  0x3d   : > { %p535_p12 = pnand %p1843_p10, %p534_p11 }
  0x3e   : > { %v2592_v60 = vld [vmem:[%s3211_s2 + $0x40] sm:$0xff] (!%p535_p12)   ;;  %s1845_s21 = sshll.u32 (!%p535_p12), %s2414_s9, 3  ;;  %v609_v63 = vld [vmem:[%s3213_s4 + $0x8] sm:$0xff] (!%p535_p12)  ;;  %vm884_vm0 = vcmask (!%p535_p12), 130048   ;;  %v2622_v3 = vld [vmem:[%s3211_s2 + $0x50] sm:$0xff] (!%p535_p12)   ;;  %s2646_s13 = sand.u32 (!%p535_p12), 1, %s2334_s28  }
  0x3f   : > { %538 = sbr.rel (%p535_p12) target bundleno = 424 (0x1a8), region = 105  ;;  %v2598_v61 = vld [vmem:[%s3211_s2] sm:$0xff] (!%p535_p12)   ;;  %p593_p13 = scmp.lt.s32.totalorder (!%p535_p12), %s1845_s21, 31  ;;  %1970 = vmatprep.subr.bf16.mxu0 (!%p535_p12), %v2592_v60  ;;  %v2611_v1 = vld [vmem:[%s3211_s2 + $0x48] sm:$0xff] (!%p535_p12)   ;;  %v2632_v4 = vld [vmem:[%s3211_s2 + $0x10] sm:$0xff] (!%p535_p12)   ;;  %v2344_v8 = vmov (!%p535_p12), 0  }
  0x40   : > { %v608_v62 = vld [vmem:[%s3213_s4] sm:$0xff] (!%p535_p12)  ;;  %1971 = vmatpush3.bf16.msra.mxu0 (!%p535_p12), %v2598_v61  ;;  %v2616_v2 = vld [vmem:[%s3211_s2 + $0x8] sm:$0xff] (!%p535_p12)   ;;  %v2643_v7 = vld [vmem:[%s3211_s2 + $0x58] sm:$0xff] (!%p535_p12)   ;;  %2263 = vset.pattern.permute.xlu1 (!%p535_p12), %v2344_v8  ;;  %s2219_s23 = smul.u32 (!%p535_p12), 320, %s2646_s13  ;;  %s1946_s26 = sshll.u32 (!%p535_p12), %s2414_s9, 9 }
  0x41   : > { %v2196_v0 = vpack.c.bf16 (!%p535_p12), %v609_v63, %v608_v62  ;;  %1972 = vmatprep.subr.bf16.mxu0 (!%p535_p12), %v2611_v1  ;;  %2262 = vset.pattern.permute.xlu0 (!%p535_p12), %v2344_v8  ;;  %v2655_v9 = vld [vmem:[%s3211_s2 + $0x18] sm:$0xff] (!%p535_p12)   ;;  %v2662_v10 = vld [vmem:[%s3211_s2 + $0x60] sm:$0xff] (!%p535_p12)   ;;  %v2679_v14 = vld [vmem:[%s3211_s2 + $0x68] sm:$0xff] (!%p535_p12)   ;;  %s1724_s18 = scalar_lea.sflag (!%p535_p12), [#allocation5], %s2646_s13  ;;  %s2345_s9 = smov (!%p535_p12), [#allocation4]  }
  0x42   : > { %v2672_v12 = vld [vmem:[%s3211_s2 + $0x20] sm:$0xff] (!%p535_p12)   ;;  %v2695_v18 = vld [vmem:[%s3211_s2 + $0x28] sm:$0xff] (!%p535_p12)   ;;  %v2702_v21 = vld [vmem:[%s3211_s2 + $0x70] sm:$0xff] (!%p535_p12)   ;;  %s2708_s22 = scalar_lea.vmem (!%p535_p12), [#allocation3], %s2219_s23  ;;  %s1844_s23 = sshll.u32 (!%p535_p12), %s2646_s13, 5 }
  0x43   : > { %2197 = vmatprep.subr.bf16.mxu1 (!%p535_p12), %v2196_v0  ;;  %v819_v23 = vld [vmem:[%s2708_s22 + $0x10] sm:$0xff] (!%p535_p12)  ;;  %v817_v26 = vld [vmem:[%s2708_s22] sm:$0xff] (!%p535_p12)  ;;  %v2727_v28 = vld [vmem:[%s3211_s2 + $0x78] sm:$0xff] (!%p535_p12)   ;;  %s3139_s24 = scalar_lea.vmem (!%p535_p12), [#allocation4], %s1844_s23  ;;  %s2284_s20 = sshll.u32 (!%p535_p12), %s2345_s9, 4  ;;  %s2285_s20 = int_to_ptr.vmem [resolvable:$false] %s2284_s20 }
  0x44   : > { %2199 = vmatpush3.bf16.msra.mxu1 (!%p535_p12), %v2196_v0  ;;  %1973 = vmatpush3.bf16.msra.mxu0 (!%p535_p12), %v2616_v2  ;;  %v2721_v27 = vld [vmem:[%s3211_s2 + $0x30] sm:$0xff] (!%p535_p12)   ;;  %v820_v29 = vld [vmem:[%s2708_s22 + $0x18] sm:$0xff] (!%p535_p12)  ;;  %v818_v30 = vld [vmem:[%s2708_s22 + $0x8] sm:$0xff] (!%p535_p12)  ;;  %s1737_s10 = sshll.u32 (!%p535_p12), %s3139_s24, 4  ;;  %s3165_s10 = int_to_ptr.vmem [resolvable:$true] %s1737_s10 }
  0x45   : > { %2020 = vmatprep.subr.bf16.mxu1 (!%p535_p12), %v2592_v60  ;;  %1974 = vmatprep.subr.bf16.mxu0 (!%p535_p12), %v2622_v3  ;;  %v2738_v31 = vld [vmem:[%s3211_s2 + $0x38] sm:$0xff] (!%p535_p12)   ;;  %v822_v33 = vld [vmem:[%s2708_s22 + $0x28] sm:$0xff] (!%p535_p12)  ;;  %v821_v35 = vld [vmem:[%s2708_s22 + $0x20] sm:$0xff] (!%p535_p12)  ;;  %s2280_s15 = scalar_lea.vmem (!%p535_p12), %s3165_s10, 512  ;;  %p2287_p3 = scmp.lt.s32.totalorder (!%p535_p12), %s3165_s10, %s2285_s20 }
  0x46   : > { %s3234_s21 = smov (!%p593_p13, %s1845_s21), 31  ;;  %837 = vperm.xlu1 %2263, %v819_v23   ;;  %827 = vperm.xlu0 %2262, %v817_v26   ;;  %v824_v38 = vld [vmem:[%s2708_s22 + $0x38] sm:$0xff]  ;;  %v823_v39 = vld [vmem:[%s2708_s22 + $0x30] sm:$0xff]  ;;  %v1876_v43 = vld [vmem:[%s2708_s22 + $0x48] sm:$0xff]  ;;  %p2281_p0 = scmp.ne.s32.totalorder %s3165_s10, %s2280_s15 }
  0x47   : > { %s1846_s19 = sshll.u32 %s3234_s21, 3  ;;  %v1875_v46 = vld [vmem:[%s2708_s22 + $0x40] sm:$0xff]  ;;  %v1878_v48 = vld [vmem:[%s2708_s22 + $0x58] sm:$0xff]  ;;  %v1877_v52 = vld [vmem:[%s2708_s22 + $0x50] sm:$0xff] }
  0x48   : > { %s2627_s25 = scalar_lea.vmem %s3212_s3, %s1846_s19  ;;  %1975 = vmatpush3.bf16.msra.mxu0 %v2632_v4  ;;  %s2218_s19 = smul.u32 160, %s2646_s13  ;;  %v1880_v56 = vld [vmem:[%s2708_s22 + $0x68] sm:$0xff]  ;;  %v1879_v57 = vld [vmem:[%s2708_s22 + $0x60] sm:$0xff]  ;;  %v1882_v63 = vld [vmem:[%s2708_s22 + $0x78] sm:$0xff] }
  0x49   : > { %v600_v5 = vld [vmem:[%s2627_s25] sm:$0xff]  ;;  %v601_v6 = vld [vmem:[%s2627_s25 + $0x8] sm:$0xff]  ;;  %1976 = vmatprep.subr.bf16.mxu0 %v2643_v7  ;;  %v602_v11 = vld [vmem:[%s2627_s25 + $0x10] sm:$0xff]  ;;  %p2282_p1 = pnand %p2281_p0, %p2436_p6 }
  0x4a   : > { %2184 = vmatprep.mubr.msk.f32.mxu1 %vm884_vm0, %v600_v5  ;;  %v603_v13 = vld [vmem:[%s2627_s25 + $0x18] sm:$0xff]  ;;  %v604_v15 = vld [vmem:[%s2627_s25 + $0x20] sm:$0xff]  ;;  %v605_v16 = vld [vmem:[%s2627_s25 + $0x28] sm:$0xff]  ;;  %s2687_s12 = scalar_lea.vmem [#allocation2], %s2218_s19  ;;  %842 = vperm.xlu1 %2263, %v820_v29   ;;  %s2286_s19 = scalar_lea.vmem %s2285_s20, 1024 }
  0x4b   : > { %2185 = vmatmul.mubr.msk.f32.vlgmr.msra.gmra.mrb[0].mxu1 %vm884_vm0, %v601_v6  ;;  %v613_v17 = vld [vmem:[%s2687_s12 + $0x8] sm:$0xff]  ;;  %v606_v20 = vld [vmem:[%s2627_s25 + $0x30] sm:$0xff]  ;;  %v607_v24 = vld [vmem:[%s2627_s25 + $0x38] sm:$0xff]  ;;  %832 = vperm.xlu0 %2262, %v818_v30   ;;  %p2283_p2 = pneg %p2282_p1  ;;  %p2288_p4 = scmp.lt.s32.totalorder %s2286_s19, %s2280_s15 }
  0x4c   : > { %2021 = vmatpush3.bf16.msra.mxu1 %v2598_v61  ;;  %1977 = vmatpush3.bf16.msra.mxu0 %v2655_v9  ;;  %v617_v19 = vunpack.c.l.s8.bf16 %v613_v17  ;;  %v2705_v22 = vld [vmem:[%s2687_s12 + $0x28] sm:$0xff]  ;;  %v612_v32 = vld [vmem:[%s2687_s12] sm:$0xff]  ;;  %v619_v36 = vunpack.c.h.s8.bf16 %v613_v17  ;;  %v615_v42 = vld [vmem:[%s2687_s12 + $0x18] sm:$0xff] }
  0x4d   : > { %2022 = vmatprep.subr.bf16.mxu1 %v2611_v1  ;;  %1978 = vmatprep.subr.bf16.mxu0 %v2662_v10  ;;  %v1020_v25 = vunpack.c.l.s8.bf16 %v2705_v22  ;;  %v616_v34 = vunpack.c.l.s8.bf16 %v612_v32  ;;  %v1871_v37 = vld [vmem:[%s2687_s12 + $0x20] sm:$0xff]  ;;  %v618_v41 = vunpack.c.h.s8.bf16 %v612_v32  ;;  %v1022_v44 = vunpack.c.h.s8.bf16 %v2705_v22  ;;  %v614_v47 = vld [vmem:[%s2687_s12 + $0x10] sm:$0xff]  ;;  %v1874_v50 = vld [vmem:[%s2687_s12 + $0x38] sm:$0xff]  ;;  %p2289_p5 = por %p2288_p4, %p2287_p3 }
  0x4e   : > { %2187 = vmatprep.mubr.msk.f32.mxu1 %vm884_vm0, %v602_v11  ;;  %784 = vmatprep.mubr.bf16.mxu0 %v617_v19  ;;  %v1019_v40 = vunpack.c.l.s8.bf16 %v1871_v37  ;;  %v621_v45 = vunpack.c.l.s8.bf16 %v615_v42  ;;  %v1021_v49 = vunpack.c.h.s8.bf16 %v1871_v37  ;;  %v620_v51 = vunpack.c.l.s8.bf16 %v614_v47  ;;  %v1873_v55 = vld [vmem:[%s2687_s12 + $0x30] sm:$0xff]  ;;  %v1884_v62 = vld [vmem:[%s2687_s12 + $0x48] sm:$0xff]  ;;  %v1883_v8 = vld [vmem:[%s2687_s12 + $0x40] sm:$0xff] }
  0x4f   : > { %2188 = vmatmul.mubr.msk.f32.gmra.mrb[2].mxu1 %vm884_vm0, %v603_v13  ;;  %852 = vperm.xlu1 %2263, %v822_v33   ;;  %v1024_v53 = vunpack.c.l.s8.bf16 %v1874_v50  ;;  %v623_v54 = vunpack.c.h.s8.bf16 %v615_v42  ;;  %v1023_v58 = vunpack.c.l.s8.bf16 %v1873_v55  ;;  %v622_v59 = vunpack.c.h.s8.bf16 %v614_v47  ;;  %v1881_v6 = vld [vmem:[%s2708_s22 + $0x70] sm:$0xff]  ;;  %v1888_v11 = vld [vmem:[%s2708_s22 + $0x88] sm:$0xff]  ;;  %v1887_v17 = vld [vmem:[%s2708_s22 + $0x80] sm:$0xff]  ;;  %p2290_p7 = pnand %p2289_p5, %p2283_p2 }
  0x50   : > { %2023 = vmatpush3.bf16.msra.mxu1 %v2616_v2  ;;  %2190 = vmatprep.mubr.msk.f32.mxu1 %vm884_vm0, %v604_v15  ;;  %v1026_v0 = vunpack.c.h.s8.bf16 %v1874_v50  ;;  %v1174_v5 = vunpack.c.l.s8.bf16 %v1884_v62  ;;  %v1025_v13 = vunpack.c.h.s8.bf16 %v1873_v55  ;;  %v1896_v15 = vld [vmem:[%s2687_s12 + $0x68] sm:$0xff]  ;;  %v1895_v22 = vld [vmem:[%s2687_s12 + $0x60] sm:$0xff]  ;;  %v1890_v23 = vld [vmem:[%s2708_s22 + $0x98] sm:$0xff]  ;;  %v1175_v26 = vunpack.c.h.s8.bf16 %v1883_v8 }
  0x51   : > { %2024 = vmatprep.subr.bf16.mxu1 %v2622_v3  ;;  %1979 = vmatpush3.bf16.msra.mxu0 %v2672_v12  ;;  %v1328_v19 = vunpack.c.l.s8.bf16 %v1896_v15  ;;  %v1886_v29 = vld [vmem:[%s2687_s12 + $0x58] sm:$0xff]  ;;  %v1892_v30 = vld [vmem:[%s2708_s22 + $0xa8] sm:$0xff]  ;;  %v1330_v32 = vunpack.c.h.s8.bf16 %v1896_v15  ;;  %v1913_v55 = vld [vmem:[%s2708_s22 + $0x110] sm:$0xff] }
  0x52   : > { %1980 = vmatprep.subr.bf16.mxu0 %v2679_v14  ;;  %847 = vperm.xlu0 %2262, %v821_v35   ;;  %v1178_v33 = vunpack.c.l.s8.bf16 %v1886_v29  ;;  %v1885_v35 = vld [vmem:[%s2687_s12 + $0x50] sm:$0xff]  ;;  %v1898_v37 = vld [vmem:[%s2687_s12 + $0x78] sm:$0xff] }
  0x53   : > { %2191 = vmatmul.mubr.msk.f32.gmra.mrb[4].mxu1 %vm884_vm0, %v605_v16  ;;  %862 = vperm.xlu1 %2263, %v824_v38   ;;  %v1173_v16 = vunpack.c.l.s8.bf16 %v1883_v8  ;;  %v1893_v38 = vld [vmem:[%s2708_s22 + $0xb0] sm:$0xff]  ;;  %v1179_v42 = vunpack.c.h.s8.bf16 %v1885_v35  ;;  %v1906_v50 = vld [vmem:[%s2708_s22 + $0xf8] sm:$0xff] }
  0x54   : > { %2025 = vmatpush3.bf16.msra.mxu1 %v2632_v4  ;;  %2193 = vmatprep.mubr.msk.f32.mxu1 %vm884_vm0, %v606_v20  ;;  %v1176_v20 = vunpack.c.h.s8.bf16 %v1884_v62 }
  0x55   : > { %2026 = vmatprep.subr.bf16.mxu1 %v2643_v7  ;;  %1981 = vmatpush3.bf16.msra.mxu0 %v2695_v18 }
  0x56   : > { %1982 = vmatprep.subr.bf16.mxu0 %v2702_v21  ;;  %857 = vperm.xlu0 %2262, %v823_v39   ;;  %v1180_v39 = vunpack.c.h.s8.bf16 %v1886_v29 }
  0x57   : > { %2194 = vmatmul.mubr.msk.f32.gmra.mrb[6].mxu1 %vm884_vm0, %v607_v24  ;;  %1108 = vperm.xlu1 %2263, %v1876_v43   ;;  %v1889_v24 = vld [vmem:[%s2708_s22 + $0x90] sm:$0xff]  ;;  %v1902_v43 = vld [vmem:[%s2708_s22 + $0xd8] sm:$0xff] }
  0x58   : > { %2027 = vmatpush3.bf16.msra.mxu1 %v2655_v9  ;;  %1059 = vmatprep.mubr.bf16.mxu1 %v1020_v25  ;;  %v1327_v25 = vunpack.c.l.s8.bf16 %v1895_v22 }
  0x59   : > { %2028 = vmatprep.subr.bf16.mxu1 %v2662_v10  ;;  %1983 = vmatpush3.bf16.msra.mxu0 %v2721_v27 }
  0x5a   : > { %1984 = vmatprep.subr.bf16.mxu0 %v2727_v28  ;;  %1103 = vperm.xlu0 %2262, %v1875_v46   ;;  %v1910_v46 = vld [vmem:[%s2687_s12 + $0x98] sm:$0xff] }
  0x5b   : > { %1118 = vperm.xlu1 %2263, %v1878_v48   ;;  %v1903_v48 = vld [vmem:[%s2708_s22 + $0xe0] sm:$0xff] }
  0x5c   : > { %2029 = vmatpush3.bf16.msra.mxu1 %v2672_v12 }
  0x5d   : > { %2030 = vmatprep.subr.bf16.mxu1 %v2679_v14  ;;  %1985 = vmatpush3.bf16.msra.mxu0 %v2738_v31 }
  0x5e   : > { %2060 = vmatprep.subr.bf16.mxu0 %v2592_v60  ;;  %1113 = vperm.xlu0 %2262, %v1877_v52   ;;  %v1912_v52 = vld [vmem:[%s2708_s22 + $0x108] sm:$0xff] }
  0x5f   : > { %1128 = vperm.xlu1 %2263, %v1880_v56   ;;  %v1916_v56 = vld [vmem:[%s2708_s22 + $0x128] sm:$0xff] }
  0x60   : > { %2031 = vmatpush3.bf16.msra.mxu1 %v2695_v18  ;;  %785 = vmatmul.mubr.bf16.vlgmr.msra.gmra.mrb[0].mxu0 %v616_v34  ;;  %v1891_v34 = vld [vmem:[%s2708_s22 + $0xa0] sm:$0xff] }
  0x61   : > { %2032 = vmatprep.subr.bf16.mxu1 %v2702_v21  ;;  %2061 = vmatpush3.bf16.msra.mxu0 %v2598_v61 }
  0x62   : > { %2062 = vmatprep.subr.bf16.mxu0 %v2611_v1  ;;  %792 = vmatprep.mubr.bf16.mxu0 %v619_v36  ;;  %v1329_v36 = vunpack.c.h.s8.bf16 %v1895_v22 }
  0x63   : > { %1123 = vperm.xlu0 %2262, %v1879_v57   ;;  %1138 = vperm.xlu1 %2263, %v1882_v63  }
  0x64   : > { %2033 = vmatpush3.bf16.msra.mxu1 %v2721_v27 }
  0x65   : > { %2034 = vmatprep.subr.bf16.mxu1 %v2727_v28  ;;  %2063 = vmatpush3.bf16.msra.mxu0 %v2616_v2 }
  0x66   : > { %2064 = vmatprep.subr.bf16.mxu0 %v2622_v3 }
  0x67   : > { %1133 = vperm.xlu0 %2262, %v1881_v6   ;;  %1262 = vperm.xlu1 %2263, %v1888_v11  }
  0x68   : > { %2035 = vmatpush3.bf16.msra.mxu1 %v2738_v31  ;;  %793 = vmatmul.mubr.bf16.gmra.mrb[4].mxu0 %v618_v41 }
  0x69   : > { %2100 = vmatprep.subr.bf16.mxu1 %v2592_v60  ;;  %2065 = vmatpush3.bf16.msra.mxu0 %v2632_v4 }
  0x6a   : > { %2066 = vmatprep.subr.bf16.mxu0 %v2643_v7  ;;  %800 = vmatprep.mubr.bf16.mxu0 %v621_v45  ;;  %v1907_v45 = vld [vmem:[%s2687_s12 + $0x80] sm:$0xff] }
  0x6b   : > { %1060 = vmatmul.mubr.bf16.vlgmr.msra.gmra.mrb[8].mxu1 %v1019_v40  ;;  %1257 = vperm.xlu0 %2262, %v1887_v17   ;;  %v1900_v40 = vld [vmem:[%s2708_s22 + $0xc8] sm:$0xff] }
  0x6c   : > { %2101 = vmatpush3.bf16.msra.mxu1 %v2598_v61  ;;  %1067 = vmatprep.mubr.bf16.mxu1 %v1022_v44 }
  0x6d   : > { %2102 = vmatprep.subr.bf16.mxu1 %v2611_v1  ;;  %2067 = vmatpush3.bf16.msra.mxu0 %v2655_v9 }
  0x6e   : > { %2068 = vmatprep.subr.bf16.mxu0 %v2662_v10  ;;  %1272 = vperm.xlu1 %2263, %v1890_v23  }
  0x6f   : > { %1267 = vperm.xlu0 %2262, %v1889_v24  }
  0x70   : > { %2103 = vmatpush3.bf16.msra.mxu1 %v2616_v2  ;;  %801 = vmatmul.mubr.bf16.gmra.mrb[8].mxu0 %v620_v51  ;;  %v1909_v51 = vld [vmem:[%s2687_s12 + $0x90] sm:$0xff] }
  0x71   : > { %2104 = vmatprep.subr.bf16.mxu1 %v2622_v3  ;;  %2069 = vmatpush3.bf16.msra.mxu0 %v2672_v12  ;;  %v1485_v57 = vunpack.c.l.s8.bf16 %v1909_v51 }
  0x72   : > { %2070 = vmatprep.subr.bf16.mxu0 %v2679_v14  ;;  %808 = vmatprep.mubr.bf16.mxu0 %v623_v54  ;;  %v1911_v54 = vld [vmem:[%s2708_s22 + $0x100] sm:$0xff] }
  0x73   : > { %1068 = vmatmul.mubr.bf16.gmra.mrb[12].mxu1 %v1021_v49  ;;  %1282 = vperm.xlu1 %2263, %v1892_v30  }
  0x74   : > { %2105 = vmatpush3.bf16.msra.mxu1 %v2632_v4  ;;  %1075 = vmatprep.mubr.bf16.mxu1 %v1024_v53  ;;  %v1483_v53 = vunpack.c.h.s8.bf16 %v1907_v45 }
  0x75   : > { %2106 = vmatprep.subr.bf16.mxu1 %v2643_v7  ;;  %2071 = vmatpush3.bf16.msra.mxu0 %v2695_v18 }
  0x76   : > { %2072 = vmatprep.subr.bf16.mxu0 %v2702_v21  ;;  %1277 = vperm.xlu0 %2262, %v1891_v34  }
  0x78   : > { %2107 = vmatpush3.bf16.msra.mxu1 %v2655_v9  ;;  %809 = vmatmul.mubr.bf16.gmra.mrb[12].mxu0 %v622_v59  ;;  %v1917_v59 = vld [vmem:[%s2708_s22 + $0x130] sm:$0xff] }
  0x79   : > { %2108 = vmatprep.subr.bf16.mxu1 %v2662_v10  ;;  %2073 = vmatpush3.bf16.msra.mxu0 %v2721_v27 }
  0x7a   : > { %2074 = vmatprep.subr.bf16.mxu0 %v2727_v28  ;;  %1213 = vmatprep.mubr.bf16.mxu0 %v1174_v5 }
  0x7b   : > { %1076 = vmatmul.mubr.bf16.gmra.mrb[16].mxu1 %v1023_v58  ;;  %1287 = vperm.xlu0 %2262, %v1893_v38   ;;  %v1915_v58 = vld [vmem:[%s2708_s22 + $0x120] sm:$0xff] }
  0x7c   : > { %2109 = vmatpush3.bf16.msra.mxu1 %v2672_v12  ;;  %1083 = vmatprep.mubr.bf16.mxu1 %v1026_v0 }
  0x7d   : > { %2110 = vmatprep.subr.bf16.mxu1 %v2679_v14  ;;  %2075 = vmatpush3.bf16.msra.mxu0 %v2738_v31 }
  0x7e   : > { %2140 = vmatprep.subr.bf16.mxu0 %v2592_v60 }
  0x80   : > { %2111 = vmatpush3.bf16.msra.mxu1 %v2695_v18  ;;  %1214 = vmatmul.mubr.bf16.vlgmr.msra.gmra.mrb[16].mxu0 %v1173_v16 }
  0x81   : > { %2112 = vmatprep.subr.bf16.mxu1 %v2702_v21  ;;  %2141 = vmatpush3.bf16.msra.mxu0 %v2598_v61 }
  0x82   : > { %2142 = vmatprep.subr.bf16.mxu0 %v2611_v1  ;;  %1221 = vmatprep.mubr.bf16.mxu0 %v1176_v20 }
  0x83   : > { %1084 = vmatmul.mubr.bf16.gmra.mrb[20].mxu1 %v1025_v13 }
  0x84   : > { %2113 = vmatpush3.bf16.msra.mxu1 %v2721_v27  ;;  %1367 = vmatprep.mubr.bf16.mxu1 %v1328_v19 }
  0x85   : > { %2114 = vmatprep.subr.bf16.mxu1 %v2727_v28  ;;  %2143 = vmatpush3.bf16.msra.mxu0 %v2616_v2 }
  0x86   : > { %2144 = vmatprep.subr.bf16.mxu0 %v2622_v3 }
  0x88   : > { %2115 = vmatpush3.bf16.msra.mxu1 %v2738_v31  ;;  %1222 = vmatmul.mubr.bf16.gmra.mrb[20].mxu0 %v1175_v26 }
  0x89   : > { %2200 = vmatprep.subr.bf16.mxu1 %v2592_v60  ;;  %2145 = vmatpush3.bf16.msra.mxu0 %v2632_v4  ;;  %v1894_v60 = vld [vmem:[%s2708_s22 + $0xb8] sm:$0xff] }
  0x8a   : > { %2146 = vmatprep.subr.bf16.mxu0 %v2643_v7  ;;  %1229 = vmatprep.mubr.bf16.mxu0 %v1178_v33 }
  0x8b   : > { %1368 = vmatmul.mubr.bf16.vlgmr.msra.gmra.mrb[24].mxu1 %v1327_v25  ;;  %1292 = vperm.xlu1 %2263, %v1894_v60  }
  0x8c   : > { %2208 = vmatpush3.bf16.msra.mxu1 %v2598_v61  ;;  %1375 = vmatprep.mubr.bf16.mxu1 %v1330_v32  ;;  %v1177_v61 = vunpack.c.l.s8.bf16 %v1885_v35 }
  0x8d   : > { %2201 = vmatprep.subr.bf16.mxu1 %v2611_v1  ;;  %2147 = vmatpush3.bf16.msra.mxu0 %v2655_v9  ;;  %v1332_v1 = vunpack.c.l.s8.bf16 %v1898_v37 }
  0x8e   : > { %2148 = vmatprep.subr.bf16.mxu0 %v2662_v10 }
  0x8f   : > { %1416 = vperm.xlu1 %2263, %v1900_v40  }
  0x90   : > { %2209 = vmatpush3.bf16.msra.mxu1 %v2616_v2  ;;  %1230 = vmatmul.mubr.bf16.gmra.mrb[24].mxu0 %v1177_v61  ;;  %v1897_v2 = vld [vmem:[%s2687_s12 + $0x70] sm:$0xff]  ;;  %v610_v61 = vlaneseq }
  0x91   : > { %2202 = vmatprep.subr.bf16.mxu1 %v2622_v3  ;;  %2149 = vmatpush3.bf16.msra.mxu0 %v2672_v12  ;;  %v1899_v3 = vld [vmem:[%s2708_s22 + $0xc0] sm:$0xff]  ;;  %v1331_v41 = vunpack.c.l.s8.bf16 %v1897_v2  ;;  %v1333_v47 = vunpack.c.h.s8.bf16 %v1897_v2 }
  0x92   : > { %2150 = vmatprep.subr.bf16.mxu0 %v2679_v14  ;;  %1237 = vmatprep.mubr.bf16.mxu0 %v1180_v39  ;;  %v2902_v38 = vand.u32 127, %v610_v61 }
  0x93   : > { %1376 = vmatmul.mubr.bf16.gmra.mrb[28].mxu1 %v1329_v36  ;;  %1411 = vperm.xlu0 %2262, %v1899_v3  }
  0x94   : > { %2210 = vmatpush3.bf16.msra.mxu1 %v2632_v4  ;;  %1383 = vmatprep.mubr.bf16.mxu1 %v1332_v1  ;;  %v1908_v4 = vld [vmem:[%s2687_s12 + $0x88] sm:$0xff]  ;;  %vm874_vm1 = vcmp.lt.s32.totalorder %v2902_v38, 16  ;;  %vm1149_vm2 = vcmp.ge.s32.totalorder %v2902_v38, 16  ;;  %vm1150_vm3 = vcmp.lt.s32.totalorder %v2902_v38, 32  ;;  %vm1303_vm5 = vcmp.ge.s32.totalorder %v2902_v38, 32  ;;  %s3163_s12 = scalar_lea.hbm %s3217_s8, %s1946_s26 }
  0x95   : > { %2203 = vmatprep.subr.bf16.mxu1 %v2643_v7  ;;  %2151 = vmatpush3.bf16.msra.mxu0 %v2695_v18  ;;  %v1334_v7 = vunpack.c.h.s8.bf16 %v1898_v37  ;;  %v1482_v44 = vunpack.c.l.s8.bf16 %v1908_v4  ;;  %v1484_v49 = vunpack.c.h.s8.bf16 %v1908_v4  ;;  %vm2919_vm4 = vmand %vm1149_vm2, %vm1150_vm3  ;;  %vm1304_vm6 = vcmp.lt.s32.totalorder %v2902_v38, 48 }
  0x96   : > { %2152 = vmatprep.subr.bf16.mxu0 %v2702_v21  ;;  %1426 = vperm.xlu1 %2263, %v1902_v43   ;;  %vm2987_vm7 = vmand %vm1303_vm5, %vm1304_vm6  ;;  %vm1457_vm8 = vcmp.ge.s32.totalorder %v2902_v38, 48  ;;  %vm1458_vm9 = vcmp.lt.s32.totalorder %v2902_v38, 64  ;;  %vm1611_vm11 = vcmp.ge.s32.totalorder %v2902_v38, 64  ;;  %vm1612_vm12 = vcmp.lt.s32.totalorder %v2902_v38, 80 }
  0x97   : > { %vm3014_vm10 = vmand %vm1457_vm8, %vm1458_vm9 }
  0x98   : > { %2211 = vmatpush3.bf16.msra.mxu1 %v2655_v9  ;;  %1238 = vmatmul.mubr.bf16.gmra.mrb[28].mxu0 %v1179_v42  ;;  %v1901_v9 = vld [vmem:[%s2708_s22 + $0xd0] sm:$0xff]  ;;  %vm3085_vm13 = vmand %vm1611_vm11, %vm1612_vm12 }
  0x99   : > { %2204 = vmatprep.subr.bf16.mxu1 %v2662_v10  ;;  %2153 = vmatpush3.bf16.msra.mxu0 %v2721_v27  ;;  %v1904_v10 = vld [vmem:[%s2708_s22 + $0xe8] sm:$0xff] }
  0x9a   : > { %2154 = vmatprep.subr.bf16.mxu0 %v2727_v28  ;;  %1521 = vmatprep.mubr.bf16.mxu0 %v1482_v44 }
  0x9b   : > { %1384 = vmatmul.mubr.bf16.gmra.mrb[32].mxu1 %v1331_v41  ;;  %1421 = vperm.xlu0 %2262, %v1901_v9  }
  0x9c   : > { %2212 = vmatpush3.bf16.msra.mxu1 %v2672_v12  ;;  %1391 = vmatprep.mubr.bf16.mxu1 %v1334_v7  ;;  %v1481_v12 = vunpack.c.l.s8.bf16 %v1907_v45 }
  0x9d   : > { %2205 = vmatprep.subr.bf16.mxu1 %v2679_v14  ;;  %1436 = vperm.xlu1 %2263, %v1904_v10   ;;  %v1488_v14 = vunpack.c.h.s8.bf16 %v1910_v46 }
  0x9e   : > { %2155 = vmatpush3.bf16.msra.mxu0 %v2738_v31 }
  0x9f   : > { %1431 = vperm.xlu0 %2262, %v1903_v48  }
  0xa0   : > { %2213 = vmatpush3.bf16.msra.mxu1 %v2695_v18  ;;  %v1905_v18 = vld [vmem:[%s2708_s22 + $0xf0] sm:$0xff] }
  0xa1   : > { %2206 = vmatprep.subr.bf16.mxu1 %v2702_v21  ;;  %1522 = vmatmul.mubr.bf16.vlgmr.msra.gmra.mrb[32].mxu0 %v1481_v12  ;;  %v1487_v21 = vunpack.c.h.s8.bf16 %v1909_v51 }
  0xa2   : > { %1529 = vmatprep.mubr.bf16.mxu0 %v1484_v49  ;;  %1446 = vperm.xlu1 %2263, %v1906_v50  }
  0xa3   : > { %1392 = vmatmul.mubr.bf16.gmra.mrb[36].mxu1 %v1333_v47  ;;  %1441 = vperm.xlu0 %2262, %v1905_v18  }
  0xa4   : > { %2214 = vmatpush3.bf16.msra.mxu1 %v2721_v27  ;;  %1545 = vmatprep.mubr.bf16.mxu1 %v1488_v14  ;;  %v1486_v27 = vunpack.c.l.s8.bf16 %v1910_v46 }
  0xa5   : > { %2207 = vmatprep.subr.bf16.mxu1 %v2727_v28  ;;  %v1914_v28 = vld [vmem:[%s2708_s22 + $0x118] sm:$0xff] }
  0xa6   : > { %1570 = vperm.xlu1 %2263, %v1912_v52  }
  0xa7   : > { %1565 = vperm.xlu0 %2262, %v1911_v54  }
  0xa8   : > { %2215 = vmatpush3.bf16.msra.mxu1 %v2738_v31  ;;  %v1918_v31 = vld [vmem:[%s2708_s22 + $0x138] sm:$0xff] }
  0xa9   : > { %1530 = vmatmul.mubr.bf16.gmra.mrb[36].mxu0 %v1483_v53 }
  0xaa   : > { %1537 = vmatprep.mubr.bf16.mxu0 %v1486_v27  ;;  %1580 = vperm.xlu1 %2263, %v1914_v28  }
  0xab   : > { %1546 = vmatmul.mubr.bf16.vlgmr.msra.gmra.mrb[40].mxu1 %v1487_v21  ;;  %1575 = vperm.xlu0 %2262, %v1913_v55  }
  0xae   : > { %1590 = vperm.xlu1 %2263, %v1916_v56  }
  0xaf   : > { %1585 = vperm.xlu0 %2262, %v1915_v58  }
  0xb1   : > { %1538 = vmatmul.mubr.bf16.gmra.mrb[40].mxu0 %v1485_v57 }
  0xb2   : > { %1600 = vperm.xlu1 %2263, %v1918_v31  }
  0xb3   : > { %1595 = vperm.xlu0 %2262, %v1917_v59  }
  0xc5   : > { %v828_v62 = vpop.permute.xlu0 %827  ;;  %v838_v63 = vpop.permute.xlu1 %837 }
  0xc9   : > { %v2866_v5 = vpop.permute.xlu1 %842 }
  0xca   : > { %v833_v0 = vpop.permute.xlu0 %832 }
  0xce   : > { %v2870_v8 = vpop.permute.xlu1 %852 }
  0xd1   : > { %v2868_v6 = vpop.permute.xlu0 %847 }
  0xd2   : > { %v2874_v13 = vpop.permute.xlu1 %862 }
  0xd5   : > { %v2872_v11 = vpop.permute.xlu0 %857 }
  0xd6   : > { %v1109_v16 = vpop.permute.xlu1 %1108 }
  0xd9   : > { %v1104_v15 = vpop.permute.xlu0 %1103 }
  0xda   : > { %v2878_v20 = vpop.permute.xlu1 %1118 }
  0xdd   : > { %v2876_v17 = vpop.permute.xlu0 %1113 }
  0xde   : > { %v2882_v24 = vpop.permute.xlu1 %1128 }
  0xe2   : > { %v2880_v23 = vpop.permute.xlu0 %1123  ;;  %v2888_v32 = vpop.permute.xlu1 %1138 }
  0xe6   : > { %v2884_v25 = vpop.permute.xlu0 %1133  ;;  %v2898_v36 = vpop.permute.xlu1 %1262 }
  0xea   : > { %v2892_v34 = vpop.permute.xlu0 %1257 }
  0xed   : > { %v2904_v1 = vpop.permute.xlu1 %1272 }
  0xee   : > { %v2900_v37 = vpop.permute.xlu0 %1267 }
  0xf2   : > { %v2909_v7 = vpop.permute.xlu1 %1282 }
  0xf5   : > { %v2906_v2 = vpop.permute.xlu0 %1277 }
  0xfa   : > { %v2913_v45 = vpop.permute.xlu0 %1287 }
 0x10a   : > { %v2925_v31 = vpop.permute.xlu1 %1292 }
 0x11e   : > { %v2186_v19 = vpop.f32.mrb[0].mxu1 }
 0x11f   : > { %v975_v22 = vpop.f32.mrb[1].mxu1 }
 0x122   : > { %v2189_v26 = vpop.f32.mrb[2].mxu1 }
 0x123   : > { %v985_v29 = vpop.f32.mrb[3].mxu1 }
 0x126   : > { %v2886_v30 = vpop.f32.mrb[4].mxu1 }
 0x127   : > { %v2890_v33 = vpop.f32.mrb[5].mxu1 }
 0x12a   : > { %v2894_v35 = vpop.f32.mrb[6].mxu1 }
 0x12b   : > { %v2896_v60 = vpop.f32.mrb[7].mxu1 }
 0x133   : > { %v1986_v39 = vpop.f32.mrb[0].mxu0 }
 0x134   : > { %v1987_v40 = vpop.f32.mrb[1].mxu0 }
 0x135   : > { %v1988_v3 = vadd.f32 %v1987_v40, %v1986_v39  ;;  %v1989_v41 = vpop.f32.mrb[2].mxu0 }
 0x136   : > { %v1990_v42 = vpop.f32.mrb[3].mxu0 }
 0x137   : > { %v865_v4 = vmul.f32 %v1988_v3, %v828_v62  ;;  %v1991_v43 = vadd.f32 %v1990_v42, %v1989_v41 }
 0x139   : > { %v876_v44 = vsel %vm874_vm1, %v865_v4, 0.0  ;;  %v866_v9 = vmul.f32 %v1991_v43, %v833_v0 }
 0x13a   : > { %v976_v10 = vadd.f32 %v975_v22, %v876_v44 }
 0x13b   : > { %v877_v47 = vsel %vm874_vm1, %v866_v9, 0.0  ;;  %v1992_v48 = vpop.f32.mrb[4].mxu0 }
 0x13c   : > { %v981_v14 = vadd.f32 %v2186_v19, %v877_v47  ;;  %v1993_v51 = vpop.f32.mrb[5].mxu0  ;;  %v2932_v19 = vpop.permute.xlu0 %1411 }
 0x13d   : > { %v1994_v52 = vadd.f32 %v1993_v51, %v1992_v48  ;;  %v1995_v53 = vpop.f32.mrb[6].mxu0 }
 0x13e   : > { %v2036_v46 = vpop.f32.mrb[8].mxu1  ;;  %v1996_v28 = vpop.f32.mrb[7].mxu0 }
 0x13f   : > { %v2037_v12 = vpop.f32.mrb[9].mxu1  ;;  %v867_v55 = vmul.f32 %v1994_v52, %v838_v63  ;;  %v1997_v56 = vadd.f32 %v1996_v28, %v1995_v53 }
 0x140   : > { %v2038_v49 = vadd.f32 %v2037_v12, %v2036_v46  ;;  %v2039_v50 = vpop.f32.mrb[10].mxu1 }
 0x141   : > { %v2040_v21 = vpop.f32.mrb[11].mxu1  ;;  %v878_v62 = vsel %vm874_vm1, %v867_v55, 0.0  ;;  %v868_v0 = vmul.f32 %v1997_v56, %v2866_v5 }
 0x142   : > { %v1141_v54 = vmul.f32 %v2038_v49, %v1104_v15  ;;  %v2041_v27 = vadd.f32 %v2040_v21, %v2039_v50  ;;  %v986_v63 = vadd.f32 %v985_v29, %v878_v62 }
 0x143   : > { %v1998_v40 = vpop.f32.mrb[8].mxu0 }
 0x144   : > { %v1152_v57 = vsel %vm2919_vm4, %v1141_v54, 0.0  ;;  %v1142_v58 = vmul.f32 %v2041_v27, %v1109_v16  ;;  %v879_v16 = vsel %vm874_vm1, %v868_v0, 0.0  ;;  %v1999_v4 = vpop.f32.mrb[9].mxu0 }
 0x145   : > { %v2927_v59 = vadd.f32 %v1152_v57, %v976_v10  ;;  %v991_v3 = vadd.f32 %v2189_v26, %v879_v16  ;;  %v2000_v5 = vadd.f32 %v1999_v4, %v1998_v40  ;;  %v2001_v44 = vpop.f32.mrb[10].mxu0 }
 0x146   : > { %v1153_v15 = vsel %vm2919_vm4, %v1142_v58, 0.0  ;;  %v2042_v22 = vpop.f32.mrb[12].mxu1  ;;  %v2002_v46 = vpop.f32.mrb[11].mxu0 }
 0x147   : > { %v2936_v61 = vadd.f32 %v1153_v15, %v981_v14  ;;  %v2043_v39 = vpop.f32.mrb[13].mxu1  ;;  %v869_v29 = vmul.f32 %v2000_v5, %v2868_v6  ;;  %v2003_v47 = vadd.f32 %v2002_v46, %v2001_v44  ;;  %v2945_v14 = vpop.permute.xlu1 %1416 }
 0x148   : > { %v2044_v41 = vadd.f32 %v2043_v39, %v2042_v22  ;;  %v2045_v42 = vpop.f32.mrb[14].mxu1 }
 0x149   : > { %v2046_v43 = vpop.f32.mrb[15].mxu1  ;;  %v880_v49 = vsel %vm874_vm1, %v869_v29, 0.0  ;;  %v870_v50 = vmul.f32 %v2003_v47, %v2870_v8 }
 0x14a   : > { %v1143_v9 = vmul.f32 %v2044_v41, %v2876_v17  ;;  %v2047_v10 = vadd.f32 %v2046_v43, %v2045_v42  ;;  %v2952_v17 = vpop.permute.xlu0 %1421  ;;  %v996_v51 = vadd.f32 %v2890_v33, %v880_v49 }
 0x14b   : > { %v2004_v54 = vpop.f32.mrb[12].mxu0  ;;  %v2967_v39 = vpop.permute.xlu1 %1426 }
 0x14c   : > { %v1154_v12 = vsel %vm2919_vm4, %v1143_v9, 0.0  ;;  %v1144_v48 = vmul.f32 %v2047_v10, %v2878_v20  ;;  %v881_v20 = vsel %vm874_vm1, %v870_v50, 0.0  ;;  %v2005_v8 = vpop.f32.mrb[13].mxu0 }
 0x14d   : > { %v2947_v26 = vadd.f32 %v1154_v12, %v986_v63  ;;  %v1001_v27 = vadd.f32 %v2886_v30, %v881_v20  ;;  %v2006_v57 = vadd.f32 %v2005_v8, %v2004_v54  ;;  %v2007_v58 = vpop.f32.mrb[14].mxu0 }
 0x14e   : > { %v1155_v6 = vsel %vm2919_vm4, %v1144_v48, 0.0  ;;  %v2048_v21 = vpop.f32.mrb[16].mxu1  ;;  %v2008_v33 = vpop.f32.mrb[15].mxu0 }
 0x14f   : > { %v2957_v52 = vadd.f32 %v1155_v6, %v991_v3  ;;  %v2049_v53 = vpop.f32.mrb[17].mxu1  ;;  %v871_v15 = vmul.f32 %v2006_v57, %v2872_v11  ;;  %v2009_v63 = vadd.f32 %v2008_v33, %v2007_v58 }
 0x150   : > { %v2050_v28 = vadd.f32 %v2049_v53, %v2048_v21  ;;  %v2051_v55 = vpop.f32.mrb[18].mxu1  ;;  %v2995_v21 = vpop.permute.xlu1 %1436 }
 0x151   : > { %v2052_v56 = vpop.f32.mrb[19].mxu1  ;;  %v882_v40 = vsel %vm874_vm1, %v871_v15, 0.0  ;;  %v872_v3 = vmul.f32 %v2009_v63, %v2874_v13 }
 0x152   : > { %v1145_v62 = vmul.f32 %v2050_v28, %v2880_v23  ;;  %v2053_v0 = vadd.f32 %v2052_v56, %v2051_v55  ;;  %v2974_v23 = vpop.permute.xlu0 %1431  ;;  %v1006_v41 = vadd.f32 %v2896_v60, %v882_v40 }
 0x153   : > { %v2076_v5 = vpop.f32.mrb[16].mxu0 }
 0x154   : > { %v1156_v22 = vsel %vm2919_vm4, %v1145_v62, 0.0  ;;  %v1146_v16 = vmul.f32 %v2053_v0, %v2882_v24  ;;  %v883_v24 = vsel %vm874_vm1, %v872_v3, 0.0  ;;  %v2077_v10 = vpop.f32.mrb[17].mxu0  ;;  %v3112_v62 = vld [vmem:[%s3215_s6] ss:$0 sm:$0xff] }
 0x155   : > { %v2969_v30 = vadd.f32 %v1156_v22, %v996_v51  ;;  %v1011_v13 = vadd.f32 %v2894_v35, %v883_v24  ;;  %v2078_v29 = vadd.f32 %v2077_v10, %v2076_v5  ;;  %v2079_v60 = vpop.f32.mrb[18].mxu0 }
 0x156   : > { %v1157_v11 = vsel %vm2919_vm4, %v1146_v16, 0.0  ;;  %v2054_v42 = vpop.f32.mrb[20].mxu1  ;;  %v2080_v49 = vpop.f32.mrb[19].mxu0 }
 0x157   : > { %v2979_v4 = vadd.f32 %v1157_v11, %v1001_v27  ;;  %v2055_v43 = vpop.f32.mrb[21].mxu1  ;;  %v1295_v50 = vmul.f32 %v2078_v29, %v2892_v34  ;;  %v2081_v6 = vadd.f32 %v2080_v49, %v2079_v60  ;;  %v3002_v54 = vpop.permute.xlu0 %1441 }
 0x158   : > { %v2056_v44 = vadd.f32 %v2055_v43, %v2054_v42  ;;  %v2057_v9 = vpop.f32.mrb[22].mxu1  ;;  %v3023_v11 = vpop.permute.xlu1 %1446 }
 0x159   : > { %v2058_v46 = vpop.f32.mrb[23].mxu1  ;;  %v1296_v53 = vmul.f32 %v2081_v6, %v2898_v36 }
 0x15a   : > { %v1147_v47 = vmul.f32 %v2056_v44, %v2884_v25  ;;  %v2059_v12 = vadd.f32 %v2058_v46, %v2057_v9  ;;  %v1306_v25 = vsel %vm2987_vm7, %v1295_v50, 0.0 }
 0x15b   : > { %v1314_v27 = vadd.f32 %v1306_v25, %v2927_v59  ;;  %v1307_v55 = vsel %vm2987_vm7, %v1296_v53, 0.0  ;;  %v2082_v56 = vpop.f32.mrb[20].mxu0 }
 0x15c   : > { %v1158_v35 = vsel %vm2919_vm4, %v1147_v47, 0.0  ;;  %v1148_v51 = vmul.f32 %v2059_v12, %v2888_v32  ;;  %v1315_v36 = vadd.f32 %v1307_v55, %v2936_v61  ;;  %v2083_v18 = vpop.f32.mrb[21].mxu0  ;;  %v1571_v53 = vpop.permute.xlu1 %1570 }
 0x15d   : > { %v2997_v20 = vadd.f32 %v1158_v35, %v1006_v41  ;;  %v2084_v0 = vadd.f32 %v2083_v18, %v2082_v56  ;;  %v2085_v33 = vpop.f32.mrb[22].mxu0 }
 0x15e   : > { %v1159_v34 = vsel %vm2919_vm4, %v1148_v51, 0.0  ;;  %v2116_v28 = vpop.f32.mrb[24].mxu1  ;;  %v2086_v22 = vpop.f32.mrb[23].mxu0 }
 0x15f   : > { %v3009_v32 = vadd.f32 %v1159_v34, %v1011_v13  ;;  %v2117_v8 = vpop.f32.mrb[25].mxu1  ;;  %v1297_v16 = vmul.f32 %v2084_v0, %v2900_v37  ;;  %v2087_v40 = vadd.f32 %v2086_v22, %v2085_v33 }
 0x160   : > { %v2118_v57 = vadd.f32 %v2117_v8, %v2116_v28  ;;  %v2119_v58 = vpop.f32.mrb[26].mxu1 }
 0x161   : > { %v2120_v59 = vpop.f32.mrb[27].mxu1  ;;  %v1308_v42 = vsel %vm2987_vm7, %v1297_v16, 0.0  ;;  %v1298_v24 = vmul.f32 %v2087_v40, %v2904_v1 }
 0x162   : > { %v1449_v15 = vmul.f32 %v2118_v57, %v2932_v19  ;;  %v2121_v63 = vadd.f32 %v2120_v59, %v2119_v58  ;;  %v3030_v19 = vpop.permute.xlu0 %1565  ;;  %v1316_v43 = vadd.f32 %v1308_v42, %v2947_v26 }
 0x163   : > { %v2088_v9 = vpop.f32.mrb[24].mxu0 }
 0x164   : > { %v1460_v61 = vsel %vm3014_vm10, %v1449_v15, 0.0  ;;  %v1450_v3 = vmul.f32 %v2121_v63, %v2945_v14  ;;  %v1309_v14 = vsel %vm2987_vm7, %v1298_v24, 0.0  ;;  %v2089_v1 = vpop.f32.mrb[25].mxu0 }
 0x165   : > { %v3025_v41 = vadd.f32 %v1460_v61, %v1314_v27  ;;  %v1317_v10 = vadd.f32 %v1309_v14, %v2957_v52  ;;  %v2090_v47 = vadd.f32 %v2089_v1, %v2088_v9  ;;  %v2091_v12 = vpop.f32.mrb[26].mxu0 }
 0x166   : > { %v1461_v37 = vsel %vm3014_vm10, %v1450_v3, 0.0  ;;  %v2122_v5 = vpop.f32.mrb[28].mxu1  ;;  %v2092_v26 = vpop.f32.mrb[27].mxu0 }
 0x167   : > { %v3035_v13 = vadd.f32 %v1461_v37, %v1315_v36  ;;  %v2123_v44 = vpop.f32.mrb[29].mxu1  ;;  %v1299_v6 = vmul.f32 %v2090_v47, %v2906_v2  ;;  %v2093_v35 = vadd.f32 %v2092_v26, %v2091_v12  ;;  %v3050_v28 = vpop.permute.xlu0 %1575 }
 0x168   : > { %v2124_v46 = vadd.f32 %v2123_v44, %v2122_v5  ;;  %v2125_v29 = vpop.f32.mrb[30].mxu1  ;;  %v3065_v3 = vpop.permute.xlu1 %1580 }
 0x169   : > { %v2126_v60 = vpop.f32.mrb[31].mxu1  ;;  %v1310_v34 = vsel %vm2987_vm7, %v1299_v6, 0.0  ;;  %v1300_v27 = vmul.f32 %v2093_v35, %v2909_v7  ;;  %v3100_v35 = vld [vmem:[%s3214_s5] ss:$0 sm:$0xff] }
 0x16a   : > { %v1451_v49 = vmul.f32 %v2124_v46, %v2952_v17  ;;  %v2127_v50 = vadd.f32 %v2126_v60, %v2125_v29  ;;  %v1318_v2 = vadd.f32 %v1310_v34, %v2969_v30 }
 0x16b   : > { %v2094_v36 = vpop.f32.mrb[28].mxu0 }
 0x16c   : > { %v1462_v51 = vsel %vm3014_vm10, %v1451_v49, 0.0  ;;  %v1452_v25 = vmul.f32 %v2127_v50, %v2967_v39  ;;  %v1311_v39 = vsel %vm2987_vm7, %v1300_v27, 0.0  ;;  %v2095_v7 = vpop.f32.mrb[29].mxu0  ;;  %v3093_v26 = vpop.permute.xlu1 %1590 }
 0x16d   : > { %v3045_v52 = vadd.f32 %v1462_v51, %v1316_v43  ;;  %v1319_v57 = vadd.f32 %v1311_v39, %v2979_v4  ;;  %v2096_v0 = vadd.f32 %v2095_v7, %v2094_v36  ;;  %v2097_v33 = vpop.f32.mrb[30].mxu0 }
 0x16e   : > { %v1463_v17 = vsel %vm3014_vm10, %v1452_v25, 0.0  ;;  %v2128_v55 = vpop.f32.mrb[32].mxu1  ;;  %v2098_v30 = vpop.f32.mrb[31].mxu0 }
 0x16f   : > { %v3055_v8 = vadd.f32 %v1463_v17, %v1317_v10  ;;  %v2129_v56 = vpop.f32.mrb[33].mxu1  ;;  %v1301_v22 = vmul.f32 %v2096_v0, %v2913_v45  ;;  %v2099_v16 = vadd.f32 %v2098_v30, %v2097_v33 }
 0x170   : > { %v2130_v58 = vadd.f32 %v2129_v56, %v2128_v55  ;;  %v2131_v18 = vpop.f32.mrb[34].mxu1 }
 0x171   : > { %v2132_v59 = vpop.f32.mrb[35].mxu1  ;;  %v1312_v42 = vsel %vm2987_vm7, %v1301_v22, 0.0  ;;  %v1302_v24 = vmul.f32 %v2099_v16, %v2925_v31 }
 0x172   : > { %v1453_v15 = vmul.f32 %v2130_v58, %v2974_v23  ;;  %v2133_v63 = vadd.f32 %v2132_v59, %v2131_v18  ;;  %v3072_v23 = vpop.permute.xlu0 %1585  ;;  %v1320_v37 = vadd.f32 %v1312_v42, %v2997_v20  ;;  %v1921_v42 = vld [vmem:[%s3216_s7] ss:$0 sm:$0xff] }
 0x174   : > { %v1464_v40 = vsel %vm3014_vm10, %v1453_v15, 0.0  ;;  %v1454_v61 = vmul.f32 %v2133_v63, %v2995_v21  ;;  %v1313_v21 = vsel %vm2987_vm7, %v1302_v24, 0.0  ;;  %v2156_v44 = vpop.f32.mrb[32].mxu0  ;;  %v1601_v63 = vpop.permute.xlu1 %1600 }
 0x175   : > { %v3067_v4 = vadd.f32 %v1464_v40, %v1318_v2  ;;  %v1321_v31 = vadd.f32 %v1313_v21, %v3009_v32  ;;  %v2157_v46 = vpop.f32.mrb[33].mxu0 }
 0x176   : > { %v1465_v45 = vsel %vm3014_vm10, %v1454_v61, 0.0  ;;  %v2134_v43 = vpop.f32.mrb[36].mxu1  ;;  %v2158_v1 = vadd.f32 %v2157_v46, %v2156_v44  ;;  %v2159_v20 = vpop.f32.mrb[34].mxu0 }
 0x177   : > { %v3077_v5 = vadd.f32 %v1465_v45, %v1319_v57  ;;  %v2135_v14 = vpop.f32.mrb[37].mxu1  ;;  %v2160_v12 = vpop.f32.mrb[35].mxu0 }
 0x178   : > { %v2136_v9 = vadd.f32 %v2135_v14, %v2134_v43  ;;  %v2137_v10 = vpop.f32.mrb[38].mxu1  ;;  %v1603_v49 = vmul.f32 %v2158_v1, %v3030_v19  ;;  %v2161_v50 = vadd.f32 %v2160_v12, %v2159_v20  ;;  %v1596_v25 = vpop.permute.xlu0 %1595 }
 0x179   : > { %v2138_v29 = vpop.f32.mrb[39].mxu1 }
 0x17a   : > { %v1455_v60 = vmul.f32 %v2136_v9, %v3002_v54  ;;  %v2139_v47 = vadd.f32 %v2138_v29, %v2137_v10  ;;  %v1614_v54 = vsel %vm3085_vm13, %v1603_v49, 0.0  ;;  %v1604_v51 = vmul.f32 %v2161_v50, %v1571_v53 }
 0x17b   : > { %v1622_v34 = vadd.f32 %v1614_v54, %v3025_v41 }
 0x17c   : > { %v1466_v38 = vsel %vm3014_vm10, %v1455_v60, 0.0  ;;  %v1456_v32 = vmul.f32 %v2139_v47, %v3023_v11  ;;  %v1615_v17 = vsel %vm3085_vm13, %v1604_v51, 0.0  ;;  %v2162_v55 = vpop.f32.mrb[36].mxu0 }
 0x17d   : > { %v1474_v6 = vadd.f32 %v1466_v38, %v1320_v37  ;;  %v1637_v39 = vadd.f32 %v3100_v35, %v1622_v34  ;;  %v1623_v56 = vadd.f32 %v1615_v17, %v3035_v13  ;;  %v2163_v53 = vpop.f32.mrb[37].mxu0 }
 0x17e   : > { %v1467_v19 = vsel %vm3014_vm10, %v1456_v32, 0.0  ;;  %v2174_v27 = vpop.f32.mrb[40].mxu1  ;;  %v2164_v58 = vadd.f32 %v2163_v53, %v2162_v55  ;;  %v2165_v18 = vpop.f32.mrb[38].mxu0 }
 0x17f   : > { %v1475_v11 = vadd.f32 %v1467_v19, %v1321_v31  ;;  %v2175_v2 = vpop.f32.mrb[41].mxu1  ;;  %v1645_v7 = vmax.f32 %v1637_v39, 0.0  ;;  %v1638_v59 = vadd.f32 %v3100_v35, %v1623_v56  ;;  %v2166_v15 = vpop.f32.mrb[39].mxu0 }
 0x180   : > { %v2176_v36 = vadd.f32 %v2175_v2, %v2174_v27  ;;  %v2177_v57 = vpop.f32.mrb[42].mxu1  ;;  %v1605_v13 = vmul.f32 %v2164_v58, %v3050_v28  ;;  %v2167_v30 = vadd.f32 %v2166_v15, %v2165_v18 }
 0x181   : > { %v2178_v41 = vpop.f32.mrb[43].mxu1  ;;  %v1660_v22 = vmul.f32 %v3112_v62, %v1645_v7  ;;  %v1646_v16 = vmax.f32 %v1638_v59, 0.0 }
 0x182   : > { %v1609_v0 = vmul.f32 %v2176_v36, %v1596_v25  ;;  %v2179_v33 = vadd.f32 %v2178_v41, %v2177_v57  ;;  %v1616_v45 = vsel %vm3085_vm13, %v1605_v13, 0.0  ;;  %v1606_v37 = vmul.f32 %v2167_v30, %v3065_v3 }
 0x183   : > { %v1661_v28 = vmul.f32 %v3112_v62, %v1646_v16  ;;  %v1624_v21 = vadd.f32 %v1616_v45, %v3045_v52  ;;  %v1675_v10 = vadd.f32 %v1921_v42, %v1660_v22 }
 0x184   : > { %v1620_v40 = vsel %vm3085_vm13, %v1609_v0, 0.0  ;;  %v1610_v61 = vmul.f32 %v2179_v33, %v1601_v63  ;;  %v1617_v31 = vsel %vm3085_vm13, %v1606_v37, 0.0  ;;  %v2168_v9 = vpop.f32.mrb[40].mxu0 }
 0x185   : > { %v1628_v24 = vadd.f32 %v1620_v40, %v1474_v6  ;;  %v1676_v46 = vadd.f32 %v1921_v42, %v1661_v28  ;;  %v1639_v29 = vadd.f32 %v3100_v35, %v1624_v21  ;;  %v1625_v3 = vadd.f32 %v1617_v31, %v3055_v8  ;;  %v2169_v1 = vpop.f32.mrb[41].mxu0 }
 0x186   : > { %v1621_v43 = vsel %vm3085_vm13, %v1610_v61, 0.0  ;;  %v2170_v47 = vadd.f32 %v2169_v1, %v2168_v9  ;;  %v2171_v12 = vpop.f32.mrb[42].mxu0 }
 0x187   : > { %v1643_v14 = vadd.f32 %v3100_v35, %v1628_v24  ;;  %v1629_v44 = vadd.f32 %v1621_v43, %v1475_v11  ;;  %v1950_v52 = vpack.c.bf16 %v1676_v46, %v1675_v10  ;;  %v1647_v49 = vmax.f32 %v1639_v29, 0.0  ;;  %v2172_v38 = vpop.f32.mrb[43].mxu0 }
 0x188   : > { %v1640_v50 = vadd.f32 %v3100_v35, %v1625_v3  ;;  %v1607_v54 = vmul.f32 %v2170_v47, %v3072_v23  ;;  %v2173_v51 = vadd.f32 %v2172_v38, %v2171_v12 }
 0x189   : > { %v1651_v20 = vmax.f32 %v1643_v14, 0.0  ;;  %v1644_v60 = vadd.f32 %v3100_v35, %v1629_v44  ;;  %1951 = vst [vmem:[%s3139_s24] sm:$0xff] %v1950_v52   ;;  %v1662_v8 = vmul.f32 %v3112_v62, %v1647_v49 }
 0x18a   : > { %v1648_v25 = vmax.f32 %v1640_v50, 0.0  ;;  %v1618_v34 = vsel %vm3085_vm13, %v1607_v54, 0.0  ;;  %v1608_v27 = vmul.f32 %v2173_v51, %v3093_v26 }
 0x18b   : > { %v1666_v32 = vmul.f32 %v3112_v62, %v1651_v20  ;;  %v1652_v6 = vmax.f32 %v1644_v60, 0.0  ;;  %v1626_v23 = vadd.f32 %v1618_v34, %v3067_v4  ;;  %v1677_v39 = vadd.f32 %v1921_v42, %v1662_v8 }
 0x18c   : > { %v1663_v11 = vmul.f32 %v3112_v62, %v1648_v25  ;;  %v1619_v55 = vsel %vm3085_vm13, %v1608_v27, 0.0 }
 0x18d   : > { %v1667_v19 = vmul.f32 %v3112_v62, %v1652_v6  ;;  %v1681_v17 = vadd.f32 %v1921_v42, %v1666_v32  ;;  %v1641_v36 = vadd.f32 %v3100_v35, %v1626_v23  ;;  %v1627_v57 = vadd.f32 %v1619_v55, %v3077_v5 }
 0x18e   : > { %v1678_v56 = vadd.f32 %v1921_v42, %v1663_v11 }
 0x18f   : > { %v1682_v2 = vadd.f32 %v1921_v42, %v1667_v19  ;;  %v1649_v41 = vmax.f32 %v1641_v36, 0.0  ;;  %v1642_v4 = vadd.f32 %v3100_v35, %v1627_v57 }
 0x190   : > { %v1955_v26 = vpack.c.bf16 %v1678_v56, %v1677_v39 }
 0x191   : > { %v1965_v53 = vpack.c.bf16 %v1682_v2, %v1681_v17  ;;  %v1664_v48 = vmul.f32 %v3112_v62, %v1649_v41  ;;  %v1650_v58 = vmax.f32 %v1642_v4, 0.0 }
 0x192   : > { %1967 = vst [vmem:[%s3139_s24 + $0x8] sm:$0xff] %v1955_v26  }
 0x193   : > { %1969 = vst [vmem:[%s3139_s24 + $0x18] sm:$0xff] %v1965_v53   ;;  %v1665_v18 = vmul.f32 %v3112_v62, %v1650_v58  ;;  %v1679_v7 = vadd.f32 %v1921_v42, %v1664_v48 }
 0x195   : > { %v1680_v59 = vadd.f32 %v1921_v42, %v1665_v18 }
 0x197   : > { %v1960_v5 = vpack.c.bf16 %v1680_v59, %v1679_v7 }
 0x199   : > { %1968 = vst [vmem:[%s3139_s24 + $0x10] sm:$0xff] %v1960_v5  }
 0x19a   : > { %2293 = shalt.err (!%p2290_p7)
}
 0x19b   : > { %s2294_s22 = scalar_lea.hbm %s3163_s12, 512  ;;  %s2298_s26 = scalar_lea.hbm %s3217_s8, 2048 }
 0x19c   : > { %p2295_p9 = scmp.ne.s32.totalorder %s3163_s12, %s2294_s22  ;;  %p2299_p12 = scmp.lt.u32.totalorder %s3163_s12, %s3217_s8 }
 0x19d   : > { %p2300_p13 = scmp.lt.u32.totalorder %s2298_s26, %s2294_s22  ;;  %p2302_p1 = scmp.lt.u32.totalorder %s2294_s22, %s3163_s12 }
 0x19e   : > { %p2296_p10 = pnand %p2295_p9, %p2436_p6 }
 0x19f   : > { %p2301_p0 = por %p2300_p13, %p2299_p12 }
 0x1a0   : > { %p2297_p11 = pneg %p2296_p10 }
 0x1a1   : > { %p2303_p2 = por %p2302_p1, %p2301_p0 }
 0x1a3   : > { %p2304_p3 = pnand %p2303_p2, %p2297_p11 }
 0x1a5   : > { %2307 = shalt.err (!%p2304_p3)
}
 0x1a6   : > { %s2346_s15 = smov 64   ;;  %s2347_s9 = smov 4  }
 0x1a7   : > { %2220 = dma.vmem_to_hbm [thread:$0]  (%p2436_p6), %s3165_s10, 512, %s3163_s12, %s1724_s18, %s2346_s15, %s2346_s15, %s2347_s9  }
 0x1a8 PF: > { %p2226_p4 = scmp.ge.s32.totalorder %s2342_s30, 2  ;;  %s1752_s20 = sand.u32 1, %s2330_s27  }
 0x1a9   : > { %s1753_s19 = scalar_lea.sflag [#allocation5], %s1752_s20 }
 0x1aa   : > { %p2223_p5 = pnand %p2226_p4, %p2440_p8 }
 0x1ac   : > { %2325 = dma.done.wait (!%p2223_p5), %s1753_s19, 512  }
 0x1ad   : > { %2327 = vsyncadd (!%p2223_p5), %s1753_s19, 4294966784  ;;  %p18_p7 = scmp.ge.s32.totalorder %s2418_s11, 6   ;;  %s3229_s27 = smov %s2334_s28 }
 0x1ae   : > { %s3230_s28 = smov %s2338_s29  ;;  %s3231_s29 = smov %s2430_s14 }
 0x1af   : > { %s3232_s30 = smov %s2418_s11  ;;  %20 = sbr.rel (!%p18_p7) target bundleno = 3 (0x3), region = 172 }
 0x1b6   :  { %1758 = vsyncpa [#allocation5], 1 }
 0x1b7   :  { %1760 = vsyncpa [#allocation5 + $0x1], 1 }

</bundles_post_ra>
